<compile_context>
chip_gen: v5e
topology: v5e:2x2
jax: 0.10.0
libtpu: 0.0.40
codegen_flags: <defaults>
</compile_context>

<pallas_src>
import functools

import jax
import jax.numpy as jnp
from jax.experimental import pallas as pl
from jax.experimental.pallas import tpu as pltpu

EPS = 1e-5
NEG_SLOPE = 0.2


def _leaky_relu(x):
    return jnp.maximum(x, NEG_SLOPE * x)


def _stats_kernel(x_ref, w1_ref, b1_ref, w2_ref, sum_ref, sq_ref, *, s_real, tm):
    """conv1 -> LeakyReLU -> conv2; accumulate per-channel sum / sumsq of y2."""
    b = pl.program_id(0)
    s = pl.program_id(1)

    @pl.when(jnp.logical_and(b == 0, s == 0))
    def _():
        sum_ref[...] = jnp.zeros_like(sum_ref)
        sq_ref[...] = jnp.zeros_like(sq_ref)

    x = x_ref[...].astype(jnp.bfloat16)                              # (c_in, tm)
    y1 = jnp.dot(w1_ref[...], x, preferred_element_type=jnp.float32)  # (c1, tm)
    y1 = _leaky_relu(y1 + b1_ref[...])
    y2 = jnp.dot(w2_ref[...], y1.astype(jnp.bfloat16),
                 preferred_element_type=jnp.float32)                  # (c2, tm)

    # Mask voxels that are only spatial padding so they don't bias batch stats.
    col = s * tm + jax.lax.broadcasted_iota(jnp.int32, (1, tm), 1)
    y2 = y2 * (col < s_real).astype(jnp.float32)

    sum_ref[...] += jnp.sum(y2, axis=1, keepdims=True)
    sq_ref[...] += jnp.sum(y2 * y2, axis=1, keepdims=True)


def _head_kernel(x_ref, w1_ref, b1_ref, w2_ref, scale_ref, shift_ref, w3_ref,
                 o_ref):
    """conv1 -> LeakyReLU -> conv2 -> BN(folded affine) -> LeakyReLU -> conv3."""
    x = x_ref[...].astype(jnp.bfloat16)                              # (c_in, tm)
    y1 = jnp.dot(w1_ref[...], x, preferred_element_type=jnp.float32)
    y1 = _leaky_relu(y1 + b1_ref[...])
    y2 = jnp.dot(w2_ref[...], y1.astype(jnp.bfloat16),
                 preferred_element_type=jnp.float32)                  # (c2, tm)
    y2 = _leaky_relu(y2 * scale_ref[...] + shift_ref[...])
    o_ref[...] = jnp.dot(w3_ref[...], y2.astype(jnp.bfloat16),
                         preferred_element_type=jnp.float32)          # (1, tm)


def pixel_discriminator_forward(x_ncdhw, params, *, tm_max=2048):
    """PixelDiscriminator.forward.  Input (N, C, D, H, W) -> output (N, 1, D, H, W)."""
    w1, b1, w2, gamma, beta, w3 = params
    n, c_in, d, h, w = x_ncdhw.shape
    c1 = w1.shape[0]            # ndf
    c2 = w2.shape[0]            # 2 * ndf
    s_real = d * h * w          # voxels per batch element

    # Voxel tile along lanes (multiple of 128); keep it big to amortize grid steps.
    tm = min(tm_max, pl.cdiv(s_real, 128) * 128)
    s_pad = pl.cdiv(s_real, tm) * tm

    # Native layout is already (batch, channels, spatial) -> free reshape, no
    # transpose and no separate cast pass over the input (cast happens in-kernel).
    x3d = x_ncdhw.reshape(n, c_in, s_real)
    if s_pad != s_real:
        x3d = jnp.pad(x3d, ((0, 0), (0, 0), (0, s_pad - s_real)))

    grid = (n, s_pad // tm)

    # PyTorch conv weights (Cout, Cin, 1, 1, 1) used directly as (Cout, Cin) lhs.
    w1m = w1.reshape(c1, c_in).astype(jnp.bfloat16)
    w2m = w2.reshape(c2, c1).astype(jnp.bfloat16)
    w3m = w3.reshape(1, c2).astype(jnp.bfloat16)
    b1c = b1.reshape(c1, 1).astype(jnp.float32)

    const = lambda b, s: (0, 0)
    x_spec = pl.BlockSpec((None, c_in, tm), lambda b, s: (b, 0, s))

    # ---- Pass 1: per-channel sum / sum-of-squares of the pre-BN activation ----
    sum_out, sq_out = pl.pallas_call(
        functools.partial(_stats_kernel, s_real=s_real, tm=tm),
        out_shape=(jax.ShapeDtypeStruct((c2, 1), jnp.float32),
                   jax.ShapeDtypeStruct((c2, 1), jnp.float32)),
        grid=grid,
        in_specs=[
            x_spec,
            pl.BlockSpec((c1, c_in), const),
            pl.BlockSpec((c1, 1), const),
            pl.BlockSpec((c2, c1), const),
        ],
        out_specs=(pl.BlockSpec((c2, 1), const),
                   pl.BlockSpec((c2, 1), const)),
        compiler_params=pltpu.CompilerParams(
            dimension_semantics=("arbitrary", "arbitrary")),
    )(x3d, w1m, b1c, w2m)

    # Fold training-mode BatchNorm3d into a per-channel affine (tiny glue math).
    m = n * s_real
    mean = sum_out[:, 0] / m
    var = jnp.maximum(sq_out[:, 0] / m - mean * mean, 0.0)   # biased variance
    scale = gamma.astype(jnp.float32) * jax.lax.rsqrt(var + EPS)
    shift = beta.astype(jnp.float32) - mean * scale

    # ---- Pass 2: full fused forward with BN applied; compact lane-dense output ----
    out = pl.pallas_call(
        _head_kernel,
        out_shape=jax.ShapeDtypeStruct((n, 1, s_pad), jnp.float32),
        grid=grid,
        in_specs=[
            x_spec,
            pl.BlockSpec((c1, c_in), const),
            pl.BlockSpec((c1, 1), const),
            pl.BlockSpec((c2, c1), const),
            pl.BlockSpec((c2, 1), const),
            pl.BlockSpec((c2, 1), const),
            pl.BlockSpec((1, c2), const),
        ],
        out_specs=pl.BlockSpec((None, 1, tm), lambda b, s: (b, 0, s)),
        compiler_params=pltpu.CompilerParams(
            dimension_semantics=("parallel", "parallel")),
    )(x3d, w1m, b1c, w2m, scale.reshape(c2, 1), shift.reshape(c2, 1), w3m)

    return out[:, :, :s_real].reshape(n, 1, d, h, w)


def init_pixel_discriminator_params(key, input_nc, ndf=64):
    """PyTorch-layout parameters.  norm_layer=BatchNorm3d => conv2/conv3 bias=False."""
    def conv_w(k, c_out, c_in):
        bound = 1.0 / (c_in ** 0.5)                      # fan_in = c_in * 1*1*1
        return jax.random.uniform(k, (c_out, c_in, 1, 1, 1),
                                  minval=-bound, maxval=bound,
                                  dtype=jnp.float32)

    k1, k1b, k2, k3 = jax.random.split(key, 4)
    w1 = conv_w(k1, ndf, input_nc)
    bound1 = 1.0 / (input_nc ** 0.5)
    b1 = jax.random.uniform(k1b, (ndf,), minval=-bound1, maxval=bound1,
                            dtype=jnp.float32)
    w2 = conv_w(k2, 2 * ndf, ndf)                        # bias=False before BN
    gamma = jnp.ones((2 * ndf,), jnp.float32)
    beta = jnp.zeros((2 * ndf,), jnp.float32)
    w3 = conv_w(k3, 1, 2 * ndf)                          # bias=False
    return (w1, b1, w2, gamma, beta, w3)


if __name__ == "__main__":
    key = jax.random.PRNGKey(0)
    kx, kp = jax.random.split(key)

    # Small shapes: batch=2, input_nc=4, ndf=64, spatial 8^3  ->  1024 voxels.
    N, INPUT_NC, NDF, S = 2, 4, 64, 8
    x = jax.random.normal(kx, (N, INPUT_NC, S, S, S), dtype=jnp.float32)
    params = init_pixel_discriminator_params(kp, INPUT_NC, NDF)

    fwd = jax.jit(pixel_discriminator_forward)
    y = jax.block_until_ready(fwd(x, params))

    assert y.shape == (N, 1, S, S, S), y.shape
    assert bool(jnp.all(jnp.isfinite(y)))
    print("KERNEL_OK")
</pallas_src>

<mosaic_0001>
module attributes {stable_mosaic.version = 11 : i64} {
  func.func @_stats_kernel(%arg0: i32, %arg1: i32, %arg2: memref<1x4x512xf32, #tpu.memory_space<vmem>>, %arg3: memref<64x4xbf16, #tpu.memory_space<vmem>>, %arg4: memref<64x1xf32, #tpu.memory_space<vmem>>, %arg5: memref<128x64xbf16, #tpu.memory_space<vmem>>, %arg6: memref<128x1xf32, #tpu.memory_space<vmem>>, %arg7: memref<128x1xf32, #tpu.memory_space<vmem>>) attributes {dimension_semantics = [#tpu.dimension_semantics<arbitrary>, #tpu.dimension_semantics<arbitrary>], iteration_bounds = array<i64: 2, 1>, scalar_prefetch = 0 : i64, scratch_operands = 0 : i64, tpu.core_type = #tpu.core_type<tc>, window_params = [{transform_indices = @transform_0, window_bounds = array<i64: 1, 4, 512>}, {pipeline_mode = #tpu.pipeline_mode<synchronous>, transform_indices = @transform_1, window_bounds = array<i64: 64, 4>}, {pipeline_mode = #tpu.pipeline_mode<synchronous>, transform_indices = @transform_2, window_bounds = array<i64: 64, 1>}, {pipeline_mode = #tpu.pipeline_mode<synchronous>, transform_indices = @transform_3, window_bounds = array<i64: 128, 64>}, {pipeline_mode = #tpu.pipeline_mode<synchronous>, transform_indices = @transform_4, window_bounds = array<i64: 128, 1>}, {pipeline_mode = #tpu.pipeline_mode<synchronous>, transform_indices = @transform_5, window_bounds = array<i64: 128, 1>}]} {
    %c0_i32 = arith.constant 0 : i32
    %0 = arith.cmpi eq, %arg0, %c0_i32 : i32
    %c0_i32_0 = arith.constant 0 : i32
    %1 = arith.cmpi eq, %arg1, %c0_i32_0 : i32
    %2 = arith.andi %0, %1 : i1
    %3 = arith.extui %2 : i1 to i32
    %c0_i32_1 = arith.constant 0 : i32
    %4 = arith.cmpi ne, %3, %c0_i32_1 : i32
    scf.if %4 {
      %cst_23 = arith.constant 0.000000e+00 : f32
      %40 = vector.broadcast %cst_23 : f32 to vector<128x1xf32>
      %c0_24 = arith.constant 0 : index
      %c0_25 = arith.constant 0 : index
      %41 = vector.load %arg6[%c0_24, %c0_25] : memref<128x1xf32, #tpu.memory_space<vmem>>, vector<128x1xf32>
      tpu.vector_store %arg6[%c0_24, %c0_25], %40 {strides = array<i32>} : memref<128x1xf32, #tpu.memory_space<vmem>>, vector<128x1xf32>,
      %cst_26 = arith.constant 0.000000e+00 : f32
      %42 = vector.broadcast %cst_26 : f32 to vector<128x1xf32>
      %c0_27 = arith.constant 0 : index
      %c0_28 = arith.constant 0 : index
      %43 = vector.load %arg7[%c0_27, %c0_28] : memref<128x1xf32, #tpu.memory_space<vmem>>, vector<128x1xf32>
      tpu.vector_store %arg7[%c0_27, %c0_28], %42 {strides = array<i32>} : memref<128x1xf32, #tpu.memory_space<vmem>>, vector<128x1xf32>,
    } else {
    }
    %c0 = arith.constant 0 : index
    %c0_2 = arith.constant 0 : index
    %c0_3 = arith.constant 0 : index
    %5 = vector.load %arg2[%c0, %c0_2, %c0_3] : memref<1x4x512xf32, #tpu.memory_space<vmem>>, vector<1x4x512xf32>
    %6 = vector.shape_cast %5 : vector<1x4x512xf32> to vector<4x512xf32>
    %7 = arith.truncf %6 : vector<4x512xf32> to vector<4x512xbf16>
    %c0_4 = arith.constant 0 : index
    %c0_5 = arith.constant 0 : index
    %8 = vector.load %arg3[%c0_4, %c0_5] : memref<64x4xbf16, #tpu.memory_space<vmem>>, vector<64x4xbf16>
    %cst = arith.constant dense<0.000000e+00> : vector<64x512xf32>
    %9 = tpu.matmul %8, %7, %cst {dimension_numbers = #tpu.dot_dimension_numbers<[1], [0], [0], [1], [0, 0, 1, 1], [], []>} : vector<64x4xbf16>, vector<4x512xbf16>, vector<64x512xf32> -> vector<64x512xf32>
    %c0_6 = arith.constant 0 : index
    %c0_7 = arith.constant 0 : index
    %10 = vector.load %arg4[%c0_6, %c0_7] : memref<64x1xf32, #tpu.memory_space<vmem>>, vector<64x1xf32>
    %11 = vector.broadcast %10 : vector<64x1xf32> to vector<64x512xf32>
    %12 = arith.addf %9, %11 : vector<64x512xf32>
    %cst_8 = arith.constant 2.000000e-01 : f32
    %13 = vector.broadcast %cst_8 : f32 to vector<64x512xf32>
    %14 = arith.mulf %13, %12 : vector<64x512xf32>
    %15 = arith.maximumf %12, %14 : vector<64x512xf32>
    %c0_9 = arith.constant 0 : index
    %c0_10 = arith.constant 0 : index
    %16 = vector.load %arg5[%c0_9, %c0_10] : memref<128x64xbf16, #tpu.memory_space<vmem>>, vector<128x64xbf16>
    %17 = arith.truncf %15 : vector<64x512xf32> to vector<64x512xbf16>
    %cst_11 = arith.constant dense<0.000000e+00> : vector<128x512xf32>
    %18 = tpu.matmul %16, %17, %cst_11 {dimension_numbers = #tpu.dot_dimension_numbers<[1], [0], [0], [1], [0, 0, 1, 1], [], []>} : vector<128x64xbf16>, vector<64x512xbf16>, vector<128x512xf32> -> vector<128x512xf32>
    %c512_i32 = arith.constant 512 : i32
    %19 = arith.muli %arg1, %c512_i32 : i32
    %20 = tpu.iota {dimensions = array<i32: 1>} : vector<1x512xi32>
    %21 = vector.broadcast %19 : i32 to vector<1x512xi32>
    %22 = arith.addi %21, %20 : vector<1x512xi32>
    %c512_i32_12 = arith.constant 512 : i32
    %23 = vector.broadcast %c512_i32_12 : i32 to vector<1x512xi32>
    %24 = arith.cmpi slt, %22, %23 : vector<1x512xi32>
    %25 = arith.extui %24 : vector<1x512xi1> to vector<1x512xi32>
    %26 = arith.sitofp %25 : vector<1x512xi32> to vector<1x512xf32>
    %27 = vector.broadcast %26 : vector<1x512xf32> to vector<128x512xf32>
    %28 = arith.mulf %18, %27 : vector<128x512xf32>
    %c0_13 = arith.constant 0 : index
    %c0_14 = arith.constant 0 : index
    %29 = vector.load %arg6[%c0_13, %c0_14] : memref<128x1xf32, #tpu.memory_space<vmem>>, vector<128x1xf32>
    %cst_15 = arith.constant dense<0.000000e+00> : vector<128xf32>
    %30 = vector.multi_reduction <add>, %28, %cst_15 [1] : vector<128x512xf32> to vector<128xf32>
    %31 = vector.shape_cast %30 : vector<128xf32> to vector<128x1xf32>
    %32 = arith.addf %29, %31 : vector<128x1xf32>
    %c0_16 = arith.constant 0 : index
    %c0_17 = arith.constant 0 : index
    %33 = vector.load %arg6[%c0_16, %c0_17] : memref<128x1xf32, #tpu.memory_space<vmem>>, vector<128x1xf32>
    tpu.vector_store %arg6[%c0_16, %c0_17], %32 {strides = array<i32>} : memref<128x1xf32, #tpu.memory_space<vmem>>, vector<128x1xf32>,
    %c0_18 = arith.constant 0 : index
    %c0_19 = arith.constant 0 : index
    %34 = vector.load %arg7[%c0_18, %c0_19] : memref<128x1xf32, #tpu.memory_space<vmem>>, vector<128x1xf32>
    %35 = arith.mulf %28, %28 : vector<128x512xf32>
    %cst_20 = arith.constant dense<0.000000e+00> : vector<128xf32>
    %36 = vector.multi_reduction <add>, %35, %cst_20 [1] : vector<128x512xf32> to vector<128xf32>
    %37 = vector.shape_cast %36 : vector<128xf32> to vector<128x1xf32>
    %38 = arith.addf %34, %37 : vector<128x1xf32>
    %c0_21 = arith.constant 0 : index
    %c0_22 = arith.constant 0 : index
    %39 = vector.load %arg7[%c0_21, %c0_22] : memref<128x1xf32, #tpu.memory_space<vmem>>, vector<128x1xf32>
    tpu.vector_store %arg7[%c0_21, %c0_22], %38 {strides = array<i32>} : memref<128x1xf32, #tpu.memory_space<vmem>>, vector<128x1xf32>,
    return
  }
  func.func @transform_0(%arg0: i32, %arg1: i32) -> (i32, i32, i32) {
    %c0_i32 = arith.constant 0 : i32
    %c0_i32_0 = arith.constant 0 : i32
    return %arg0, %c0_i32, %arg1 : i32, i32, i32
  }
  func.func @transform_1(%arg0: i32, %arg1: i32) -> (i32, i32) {
    %c0_i32 = arith.constant 0 : i32
    %c0_i32_0 = arith.constant 0 : i32
    %c0_i32_1 = arith.constant 0 : i32
    return %c0_i32, %c0_i32_0 : i32, i32
  }
  func.func @transform_2(%arg0: i32, %arg1: i32) -> (i32, i32) {
    %c0_i32 = arith.constant 0 : i32
    %c0_i32_0 = arith.constant 0 : i32
    %c0_i32_1 = arith.constant 0 : i32
    return %c0_i32, %c0_i32_0 : i32, i32
  }
  func.func @transform_3(%arg0: i32, %arg1: i32) -> (i32, i32) {
    %c0_i32 = arith.constant 0 : i32
    %c0_i32_0 = arith.constant 0 : i32
    %c0_i32_1 = arith.constant 0 : i32
    return %c0_i32, %c0_i32_0 : i32, i32
  }
  func.func @transform_4(%arg0: i32, %arg1: i32) -> (i32, i32) {
    %c0_i32 = arith.constant 0 : i32
    %c0_i32_0 = arith.constant 0 : i32
    %c0_i32_1 = arith.constant 0 : i32
    return %c0_i32, %c0_i32_0 : i32, i32
  }
  func.func @transform_5(%arg0: i32, %arg1: i32) -> (i32, i32) {
    %c0_i32 = arith.constant 0 : i32
    %c0_i32_0 = arith.constant 0 : i32
    %c0_i32_1 = arith.constant 0 : i32
    return %c0_i32, %c0_i32_0 : i32, i32
  }
}

module attributes {stable_mosaic.version = 11 : i64} {
  func.func @_head_kernel(%arg0: i32, %arg1: i32, %arg2: memref<1x4x512xf32, #tpu.memory_space<vmem>>, %arg3: memref<64x4xbf16, #tpu.memory_space<vmem>>, %arg4: memref<64x1xf32, #tpu.memory_space<vmem>>, %arg5: memref<128x64xbf16, #tpu.memory_space<vmem>>, %arg6: memref<128x1xf32, #tpu.memory_space<vmem>>, %arg7: memref<128x1xf32, #tpu.memory_space<vmem>>, %arg8: memref<1x128xbf16, #tpu.memory_space<vmem>>, %arg9: memref<1x1x512xf32, #tpu.memory_space<vmem>>) attributes {dimension_semantics = [#tpu.dimension_semantics<parallel>, #tpu.dimension_semantics<parallel>], iteration_bounds = array<i64: 2, 1>, scalar_prefetch = 0 : i64, scratch_operands = 0 : i64, tpu.core_type = #tpu.core_type<tc>, window_params = [{transform_indices = @transform_0, window_bounds = array<i64: 1, 4, 512>}, {pipeline_mode = #tpu.pipeline_mode<synchronous>, transform_indices = @transform_1, window_bounds = array<i64: 64, 4>}, {pipeline_mode = #tpu.pipeline_mode<synchronous>, transform_indices = @transform_2, window_bounds = array<i64: 64, 1>}, {pipeline_mode = #tpu.pipeline_mode<synchronous>, transform_indices = @transform_3, window_bounds = array<i64: 128, 64>}, {pipeline_mode = #tpu.pipeline_mode<synchronous>, transform_indices = @transform_4, window_bounds = array<i64: 128, 1>}, {pipeline_mode = #tpu.pipeline_mode<synchronous>, transform_indices = @transform_5, window_bounds = array<i64: 128, 1>}, {pipeline_mode = #tpu.pipeline_mode<synchronous>, transform_indices = @transform_6, window_bounds = array<i64: 1, 128>}, {transform_indices = @transform_7, window_bounds = array<i64: 1, 1, 512>}]} {
    %c0 = arith.constant 0 : index
    %c0_0 = arith.constant 0 : index
    %c0_1 = arith.constant 0 : index
    %0 = vector.load %arg2[%c0, %c0_0, %c0_1] : memref<1x4x512xf32, #tpu.memory_space<vmem>>, vector<1x4x512xf32>
    %1 = vector.shape_cast %0 : vector<1x4x512xf32> to vector<4x512xf32>
    %2 = arith.truncf %1 : vector<4x512xf32> to vector<4x512xbf16>
    %c0_2 = arith.constant 0 : index
    %c0_3 = arith.constant 0 : index
    %3 = vector.load %arg3[%c0_2, %c0_3] : memref<64x4xbf16, #tpu.memory_space<vmem>>, vector<64x4xbf16>
    %cst = arith.constant dense<0.000000e+00> : vector<64x512xf32>
    %4 = tpu.matmul %3, %2, %cst {dimension_numbers = #tpu.dot_dimension_numbers<[1], [0], [0], [1], [0, 0, 1, 1], [], []>} : vector<64x4xbf16>, vector<4x512xbf16>, vector<64x512xf32> -> vector<64x512xf32>
    %c0_4 = arith.constant 0 : index
    %c0_5 = arith.constant 0 : index
    %5 = vector.load %arg4[%c0_4, %c0_5] : memref<64x1xf32, #tpu.memory_space<vmem>>, vector<64x1xf32>
    %6 = vector.broadcast %5 : vector<64x1xf32> to vector<64x512xf32>
    %7 = arith.addf %4, %6 : vector<64x512xf32>
    %cst_6 = arith.constant 2.000000e-01 : f32
    %8 = vector.broadcast %cst_6 : f32 to vector<64x512xf32>
    %9 = arith.mulf %8, %7 : vector<64x512xf32>
    %10 = arith.maximumf %7, %9 : vector<64x512xf32>
    %c0_7 = arith.constant 0 : index
    %c0_8 = arith.constant 0 : index
    %11 = vector.load %arg5[%c0_7, %c0_8] : memref<128x64xbf16, #tpu.memory_space<vmem>>, vector<128x64xbf16>
    %12 = arith.truncf %10 : vector<64x512xf32> to vector<64x512xbf16>
    %cst_9 = arith.constant dense<0.000000e+00> : vector<128x512xf32>
    %13 = tpu.matmul %11, %12, %cst_9 {dimension_numbers = #tpu.dot_dimension_numbers<[1], [0], [0], [1], [0, 0, 1, 1], [], []>} : vector<128x64xbf16>, vector<64x512xbf16>, vector<128x512xf32> -> vector<128x512xf32>
    %c0_10 = arith.constant 0 : index
    %c0_11 = arith.constant 0 : index
    %14 = vector.load %arg6[%c0_10, %c0_11] : memref<128x1xf32, #tpu.memory_space<vmem>>, vector<128x1xf32>
    %15 = vector.broadcast %14 : vector<128x1xf32> to vector<128x512xf32>
    %16 = arith.mulf %13, %15 : vector<128x512xf32>
    %c0_12 = arith.constant 0 : index
    %c0_13 = arith.constant 0 : index
    %17 = vector.load %arg7[%c0_12, %c0_13] : memref<128x1xf32, #tpu.memory_space<vmem>>, vector<128x1xf32>
    %18 = vector.broadcast %17 : vector<128x1xf32> to vector<128x512xf32>
    %19 = arith.addf %16, %18 : vector<128x512xf32>
    %cst_14 = arith.constant 2.000000e-01 : f32
    %20 = vector.broadcast %cst_14 : f32 to vector<128x512xf32>
    %21 = arith.mulf %20, %19 : vector<128x512xf32>
    %22 = arith.maximumf %19, %21 : vector<128x512xf32>
    %c0_15 = arith.constant 0 : index
    %c0_16 = arith.constant 0 : index
    %23 = vector.load %arg8[%c0_15, %c0_16] : memref<1x128xbf16, #tpu.memory_space<vmem>>, vector<1x128xbf16>
    %24 = arith.truncf %22 : vector<128x512xf32> to vector<128x512xbf16>
    %cst_17 = arith.constant dense<0.000000e+00> : vector<1x512xf32>
    %25 = tpu.matmul %23, %24, %cst_17 {dimension_numbers = #tpu.dot_dimension_numbers<[1], [0], [0], [1], [0, 0, 1, 1], [], []>} : vector<1x128xbf16>, vector<128x512xbf16>, vector<1x512xf32> -> vector<1x512xf32>
    %c0_18 = arith.constant 0 : index
    %c0_19 = arith.constant 0 : index
    %c0_20 = arith.constant 0 : index
    %26 = vector.load %arg9[%c0_18, %c0_19, %c0_20] : memref<1x1x512xf32, #tpu.memory_space<vmem>>, vector<1x1x512xf32>
    %27 = vector.shape_cast %26 : vector<1x1x512xf32> to vector<1x512xf32>
    %28 = vector.shape_cast %25 : vector<1x512xf32> to vector<1x1x512xf32>
    tpu.vector_store %arg9[%c0_18, %c0_19, %c0_20], %28 {strides = array<i32>} : memref<1x1x512xf32, #tpu.memory_space<vmem>>, vector<1x1x512xf32>,
    return
  }
  func.func @transform_0(%arg0: i32, %arg1: i32) -> (i32, i32, i32) {
    %c0_i32 = arith.constant 0 : i32
    %c0_i32_0 = arith.constant 0 : i32
    return %arg0, %c0_i32, %arg1 : i32, i32, i32
  }
  func.func @transform_1(%arg0: i32, %arg1: i32) -> (i32, i32) {
    %c0_i32 = arith.constant 0 : i32
    %c0_i32_0 = arith.constant 0 : i32
    %c0_i32_1 = arith.constant 0 : i32
    return %c0_i32, %c0_i32_0 : i32, i32
  }
  func.func @transform_2(%arg0: i32, %arg1: i32) -> (i32, i32) {
    %c0_i32 = arith.constant 0 : i32
    %c0_i32_0 = arith.constant 0 : i32
    %c0_i32_1 = arith.constant 0 : i32
    return %c0_i32, %c0_i32_0 : i32, i32
  }
  func.func @transform_3(%arg0: i32, %arg1: i32) -> (i32, i32) {
    %c0_i32 = arith.constant 0 : i32
    %c0_i32_0 = arith.constant 0 : i32
    %c0_i32_1 = arith.constant 0 : i32
    return %c0_i32, %c0_i32_0 : i32, i32
  }
  func.func @transform_4(%arg0: i32, %arg1: i32) -> (i32, i32) {
    %c0_i32 = arith.constant 0 : i32
    %c0_i32_0 = arith.constant 0 : i32
    %c0_i32_1 = arith.constant 0 : i32
    return %c0_i32, %c0_i32_0 : i32, i32
  }
  func.func @transform_5(%arg0: i32, %arg1: i32) -> (i32, i32) {
    %c0_i32 = arith.constant 0 : i32
    %c0_i32_0 = arith.constant 0 : i32
    %c0_i32_1 = arith.constant 0 : i32
    return %c0_i32, %c0_i32_0 : i32, i32
  }
  func.func @transform_6(%arg0: i32, %arg1: i32) -> (i32, i32) {
    %c0_i32 = arith.constant 0 : i32
    %c0_i32_0 = arith.constant 0 : i32
    %c0_i32_1 = arith.constant 0 : i32
    return %c0_i32, %c0_i32_0 : i32, i32
  }
  func.func @transform_7(%arg0: i32, %arg1: i32) -> (i32, i32, i32) {
    %c0_i32 = arith.constant 0 : i32
    %c0_i32_0 = arith.constant 0 : i32
    return %arg0, %c0_i32, %arg1 : i32, i32, i32
  }
}

</mosaic_0001>

<bundles_post_ra>
// kernel: pixel_discriminator_forward.2
= control target key start
LH: loop header
LB: loop body
LE: loop exit
PB: predicated region body
PF: predicated region fallthrough
CT: control target
= control target key end

     0   :  { %s1530_s18 = smov 0   ;;  %s1532_s19 = smov 0   ;;  %s2171_s0 = inlined_call_operand.vmem [shape: f32[2,4,512], index: 0, kind: input, shape index: {}]   ;;  %s2172_s1 = inlined_call_operand.vmem [shape: bf16[64,4], index: 1, kind: input, shape index: {}]   ;;  %s2173_s2 = inlined_call_operand.vmem [shape: f32[64,1], index: 2, kind: input, shape index: {}]   ;;  %s2174_s3 = inlined_call_operand.vmem [shape: bf16[128,64], index: 3, kind: input, shape index: {}]   ;;  %s2175_s4 = inlined_call_operand.vmem [shape: f32[128,1], index: 4, kind: output, shape index: {0}]   ;;  %s2176_s5 = inlined_call_operand.vmem [shape: f32[128,1], index: 5, kind: output, shape index: {1}]  }
   0x1   :  { %s1534_s20 = smov 0  }
   0x2 LB: > { %s28_s21 = sadd.s32 1, %s1492_s19  ;;  %p1329_p0 = scmp.ge.s32.totalorder %s1496_s20, 1  ;;  %s1496_s20 = sphi %s1534_s20, %s16_s20   ;;  %s1492_s19 = sphi %s1532_s19, %s2188_s19   ;;  %s1488_s18 = sphi %s1530_s18, %s2187_s18  }
   0x3   : > { %p30_p1 = scmp.ge.s32.totalorder %s28_s21, 2  ;;  %p199_p2 = scmp.lt.s32.totalorder %s1496_s20, 3 }
   0x5   : > { %s2190_s21 = smov (%p30_p1, %s28_s21), 0  ;;  %p200_p3 = pnand %p1329_p0, %p199_p2 }
   0x7   : > { %203 = sbr.rel (%p200_p3) target bundleno = 656 (0x290), region = 36 }
   0xc   : > { %p227_p4 = scmp.lt.s32.totalorder %s1488_s18, 1  ;;  %p237_p5 = scmp.eq.s32.totalorder %s1488_s18, 0 }
   0xd   : > { %vm243_vm0 = vcmask (%p237_p5), 7168   ;;  %v1498_v0 = vmov (%p237_p5), 0.0  }
   0xe   : > { %s2192_s18 = smov (!%p227_p4, %s1488_s18), 1  ;;  %242 = sbr.rel (!%p237_p5) target bundleno = 46 (0x2e), region = 40  ;;  %244 = vst.msk [vmem:[%s2175_s4] sm:$0xff] (%p237_p5), %vm243_vm0, %v1498_v0 }
   0xf   : > { %s1431_s22 = sshll.u32 %s2192_s18, 4  ;;  %245 = vst.msk [vmem:[%s2175_s4 + $0x8] sm:$0xff] (%p237_p5), %vm243_vm0, %v1498_v0 }
  0x10   : > { %s1551_s25 = scalar_lea.vmem %s2171_s0, %s1431_s22  ;;  %246 = vst.msk [vmem:[%s2175_s4 + $0x10] sm:$0xff] (%p237_p5), %vm243_vm0, %v1498_v0 }
  0x11   : > { %247 = vst.msk [vmem:[%s2175_s4 + $0x18] sm:$0xff] (%p237_p5), %vm243_vm0, %v1498_v0 }
  0x12   : > { %248 = vst.msk [vmem:[%s2175_s4 + $0x20] sm:$0xff] (%p237_p5), %vm243_vm0, %v1498_v0 }
  0x13   : > { %249 = vst.msk [vmem:[%s2175_s4 + $0x28] sm:$0xff] %vm243_vm0, %v1498_v0 }
  0x14   : > { %250 = vst.msk [vmem:[%s2175_s4 + $0x30] sm:$0xff] %vm243_vm0, %v1498_v0 }
  0x15   : > { %251 = vst.msk [vmem:[%s2175_s4 + $0x38] sm:$0xff] %vm243_vm0, %v1498_v0 }
  0x16   : > { %252 = vst.msk [vmem:[%s2175_s4 + $0x40] sm:$0xff] %vm243_vm0, %v1498_v0 }
  0x17   : > { %253 = vst.msk [vmem:[%s2175_s4 + $0x48] sm:$0xff] %vm243_vm0, %v1498_v0 }
  0x18   : > { %254 = vst.msk [vmem:[%s2175_s4 + $0x50] sm:$0xff] %vm243_vm0, %v1498_v0 }
  0x19   : > { %255 = vst.msk [vmem:[%s2175_s4 + $0x58] sm:$0xff] %vm243_vm0, %v1498_v0 }
  0x1a   : > { %256 = vst.msk [vmem:[%s2175_s4 + $0x60] sm:$0xff] %vm243_vm0, %v1498_v0 }
  0x1b   : > { %257 = vst.msk [vmem:[%s2175_s4 + $0x68] sm:$0xff] %vm243_vm0, %v1498_v0 }
  0x1c   : > { %258 = vst.msk [vmem:[%s2175_s4 + $0x70] sm:$0xff] %vm243_vm0, %v1498_v0 }
  0x1d   : > { %259 = vst.msk [vmem:[%s2175_s4 + $0x78] sm:$0xff] %vm243_vm0, %v1498_v0 }
  0x1e   : > { %260 = vst.msk [vmem:[%s2176_s5] sm:$0xff] %vm243_vm0, %v1498_v0 }
  0x1f   : > { %261 = vst.msk [vmem:[%s2176_s5 + $0x8] sm:$0xff] %vm243_vm0, %v1498_v0 }
  0x20   : > { %262 = vst.msk [vmem:[%s2176_s5 + $0x10] sm:$0xff] %vm243_vm0, %v1498_v0 }
  0x21   : > { %263 = vst.msk [vmem:[%s2176_s5 + $0x18] sm:$0xff] %vm243_vm0, %v1498_v0 }
  0x22   : > { %264 = vst.msk [vmem:[%s2176_s5 + $0x20] sm:$0xff] %vm243_vm0, %v1498_v0 }
  0x23   : > { %265 = vst.msk [vmem:[%s2176_s5 + $0x28] sm:$0xff] %vm243_vm0, %v1498_v0 }
  0x24   : > { %266 = vst.msk [vmem:[%s2176_s5 + $0x30] sm:$0xff] %vm243_vm0, %v1498_v0 }
  0x25   : > { %267 = vst.msk [vmem:[%s2176_s5 + $0x38] sm:$0xff] %vm243_vm0, %v1498_v0 }
  0x26   : > { %268 = vst.msk [vmem:[%s2176_s5 + $0x40] sm:$0xff] %vm243_vm0, %v1498_v0 }
  0x27   : > { %269 = vst.msk [vmem:[%s2176_s5 + $0x48] sm:$0xff] %vm243_vm0, %v1498_v0 }
  0x28   : > { %270 = vst.msk [vmem:[%s2176_s5 + $0x50] sm:$0xff] %vm243_vm0, %v1498_v0 }
  0x29   : > { %271 = vst.msk [vmem:[%s2176_s5 + $0x58] sm:$0xff] %vm243_vm0, %v1498_v0 }
  0x2a   : > { %272 = vst.msk [vmem:[%s2176_s5 + $0x60] sm:$0xff] %vm243_vm0, %v1498_v0 }
  0x2b   : > { %273 = vst.msk [vmem:[%s2176_s5 + $0x68] sm:$0xff] %vm243_vm0, %v1498_v0 }
  0x2c   : > { %274 = vst.msk [vmem:[%s2176_s5 + $0x70] sm:$0xff] %vm243_vm0, %v1498_v0 }
  0x2d   : > { %275 = vst.msk [vmem:[%s2176_s5 + $0x78] sm:$0xff] %vm243_vm0, %v1498_v0 }
  0x2e PF: > { %v276_v1 = vld [vmem:[%s1551_s25] sm:$0xff]  ;;  %v277_v2 = vld [vmem:[%s1551_s25 + $0x8] sm:$0xff]  ;;  %v1499_v3 = vmov 0   ;;  %v309_v4 = vld [vmem:[%s2173_s2 + $0x30] sm:$0xff]  ;;  %vm384_vm1 = vcmask 1041408   ;;  %vm371_vm2 = vcmask 31744  }
  0x2f   : > { %280 = vst [vmem:[#allocation1] ss:$2 sm:$0xff] %v276_v1  ;;  %1471 = vset.pattern.permute.xlu0 %v1499_v3  ;;  %1472 = vset.pattern.permute.xlu1 %v1499_v3  ;;  %v307_v5 = vld [vmem:[%s2173_s2 + $0x20] sm:$0xff]  ;;  %v310_v6 = vld [vmem:[%s2173_s2 + $0x38] sm:$0xff]  ;;  %v308_v7 = vld [vmem:[%s2173_s2 + $0x28] sm:$0xff]  ;;  %vm649_vm3 = vcmask 523264  }
  0x30   : > { %282 = vst [vmem:[#allocation1 + $0x10] ss:$2 sm:$0xff] %v277_v2  ;;  %343 = vperm.xlu0 %1471, %v309_v4   ;;  %333 = vperm.xlu1 %1472, %v307_v5   ;;  %v1433_v18 = vld [vmem:[%s2172_s1] sm:$0xff]  ;;  %v304_v22 = vld [vmem:[%s2173_s2 + $0x8] sm:$0xff]  ;;  %v305_v24 = vld [vmem:[%s2173_s2 + $0x10] sm:$0xff]  ;;  %vm1069_vm4 = vcmask 7168  }
  0x31   : > { %1473 = vset.pattern.permute.xlu2 %v1499_v3  ;;  %v303_v21 = vld [vmem:[%s2173_s2] sm:$0xff]  ;;  %v1434_v23 = vld [vmem:[%s2172_s1 + $0x8] sm:$0xff]  ;;  %v306_v25 = vld [vmem:[%s2173_s2 + $0x18] sm:$0xff] }
  0x32   : > { %323 = vperm.xlu2 %1473, %v305_v24   ;;  %v1435_v26 = vld [vmem:[%s2172_s1 + $0x10] sm:$0xff]  ;;  %v1436_v27 = vld [vmem:[%s2172_s1 + $0x18] sm:$0xff] }
  0x36   : > { %v283_v8 = vld.sshfl [vmem:[#allocation1] sm:$0xff pattern:$0x75316420]  ;;  %v284_v9 = vld.sshfl [vmem:[#allocation1 + $0x8] sm:$0xff pattern:$0x75316420] }
  0x37   : > { %v291_v10 = vpack.c.bf16 %v283_v8, %v283_v8  ;;  %v292_v11 = vpack.c.bf16 %v284_v9, %v284_v9  ;;  %v285_v12 = vld.sshfl [vmem:[#allocation1 + $0x10] sm:$0xff pattern:$0x75316420]  ;;  %v286_v13 = vld.sshfl [vmem:[#allocation1 + $0x18] sm:$0xff pattern:$0x75316420] }
  0x38   : > { %v293_v14 = vpack.c.bf16 %v285_v12, %v285_v12  ;;  %v294_v15 = vpack.c.bf16 %v286_v13, %v286_v13  ;;  %348 = vperm.xlu0 %1471, %v310_v6   ;;  %338 = vperm.xlu1 %1472, %v308_v7  }
  0x39   : > { %v386_v16 = vsel %vm384_vm1, %v291_v10, 0  ;;  %v389_v17 = vsel %vm384_vm1, %v292_v11, 0 }
  0x3a   : > { %404 = vmatpush.bf16.msra.mxu0 %v386_v16  ;;  %433 = vmatpush.bf16.msra.mxu1 %v389_v17  ;;  %v392_v19 = vsel %vm384_vm1, %v293_v14, 0  ;;  %v395_v20 = vsel %vm384_vm1, %v294_v15, 0 }
  0x3b   : > { %462 = vmatpush.bf16.msra.mxu2 %v392_v19  ;;  %491 = vmatpush.bf16.msra.mxu3 %v395_v20 }
  0x3c   : > { %328 = vperm.xlu2 %1473, %v306_v25  }
  0x3d   : > { %1349 = vmatmul.msk.bf16.vlgmr.msra.gmra.mxu0 %vm371_vm2, %v1433_v18  ;;  %1353 = vmatmul.msk.bf16.vlgmr.msra.gmra.mxu1 %vm371_vm2, %v1433_v18 }
  0x3e   : > { %1357 = vmatmul.msk.bf16.vlgmr.msra.gmra.mxu2 %vm371_vm2, %v1433_v18  ;;  %1361 = vmatmul.msk.bf16.vlgmr.msra.gmra.mxu3 %vm371_vm2, %v1433_v18 }
  0x40   : > { %313 = vperm.xlu0 %1471, %v303_v21   ;;  %318 = vperm.xlu1 %1472, %v304_v22  }
  0x4d   : > { %1350 = vmatmul.msk.bf16.gmra.mxu0 %vm371_vm2, %v1434_v23  ;;  %1354 = vmatmul.msk.bf16.gmra.mxu1 %vm371_vm2, %v1434_v23 }
  0x4e   : > { %1358 = vmatmul.msk.bf16.gmra.mxu2 %vm371_vm2, %v1434_v23  ;;  %1362 = vmatmul.msk.bf16.gmra.mxu3 %vm371_vm2, %v1434_v23 }
  0x5d   : > { %1351 = vmatmul.msk.bf16.gmra.mxu0 %vm371_vm2, %v1435_v26  ;;  %1355 = vmatmul.msk.bf16.gmra.mxu1 %vm371_vm2, %v1435_v26 }
  0x5e   : > { %1359 = vmatmul.msk.bf16.gmra.mxu2 %vm371_vm2, %v1435_v26  ;;  %1363 = vmatmul.msk.bf16.gmra.mxu3 %vm371_vm2, %v1435_v26 }
  0x6d   : > { %1352 = vmatmul.msk.bf16.gmra.mxu0 %vm371_vm2, %v1436_v27  ;;  %1356 = vmatmul.msk.bf16.gmra.mxu1 %vm371_vm2, %v1436_v27 }
  0x6e   : > { %1360 = vmatmul.msk.bf16.gmra.mxu2 %vm371_vm2, %v1436_v27  ;;  %1364 = vmatmul.msk.bf16.gmra.mxu3 %vm371_vm2, %v1436_v27 }
  0x8c   : > { %v324_v50 = vpop.permute.xlu2 %323 }
  0x96   : > { %v1769_v1 = vpop.permute.xlu2 %328 }
  0xa2   : > { %v1743_v38 = vpop.permute.xlu0 %343  ;;  %v1745_v43 = vpop.permute.xlu1 %333 }
  0xaa   : > { %v1751_v48 = vpop.permute.xlu0 %348  ;;  %v1753_v49 = vpop.permute.xlu1 %338 }
  0xb2   : > { %v314_v55 = vpop.permute.xlu0 %313  ;;  %v1763_v58 = vpop.permute.xlu1 %318 }
  0xba   : > { %v406_v28 = vpop.f32.mrf.mxu0  ;;  %v435_v29 = vpop.f32.mrf.mxu1 }
  0xbb   : > { %v1759_v56 = vadd.f32 %v406_v28, %v314_v55  ;;  %v1761_v57 = vadd.f32 %v435_v29, %v314_v55 }
  0xbd   : > { %v1772_v2 = vmul.f32 0.2, %v1759_v56  ;;  %v1775_v3 = vmul.f32 0.2, %v1761_v57 }
  0xc1   : > { %v464_v30 = vpop.f32.mrf.mxu2  ;;  %v493_v31 = vpop.f32.mrf.mxu3 }
  0xc2   : > { %v408_v32 = vpop.f32.mrf.mxu0  ;;  %v437_v33 = vpop.f32.mrf.mxu1  ;;  %v1801_v14 = vadd.f32 %v464_v30, %v314_v55  ;;  %v1808_v18 = vadd.f32 %v493_v31, %v314_v55 }
  0xc3   : > { %v1778_v4 = vadd.f32 %v408_v32, %v1763_v58  ;;  %v1781_v5 = vadd.f32 %v437_v33, %v1763_v58 }
  0xc4   : > { %2179 = vst [vmem:[#allocation2_spill] sm:$0xff] %v1801_v14 }
  0xc5   : > { %2180 = vst [vmem:[#allocation3_spill] sm:$0xff] %v1808_v18  ;;  %v1811_v19 = vmul.f32 0.2, %v1778_v4  ;;  %v1814_v20 = vmul.f32 0.2, %v1781_v5 }
  0xc9   : > { %v1739_v34 = vpop.f32.mrf.mxu2  ;;  %v1741_v35 = vpop.f32.mrf.mxu3 }
  0xca   : > { %v411_v36 = vpop.f32.mrf.mxu0  ;;  %v440_v37 = vpop.f32.mrf.mxu1 }
  0xcb   : > { %v1765_v61 = vadd.f32 %v411_v36, %v324_v50  ;;  %v1767_v62 = vadd.f32 %v440_v37, %v324_v50 }
  0xcd   : > { %v1784_v6 = vmul.f32 0.2, %v1765_v61  ;;  %v1787_v7 = vmul.f32 0.2, %v1767_v62 }
  0xd1   : > { %v469_v39 = vpop.f32.mrf.mxu2  ;;  %v498_v40 = vpop.f32.mrf.mxu3 }
  0xd2   : > { %v413_v41 = vpop.f32.mrf.mxu0  ;;  %v442_v42 = vpop.f32.mrf.mxu1  ;;  %v1827_v36 = vadd.f32 %v469_v39, %v324_v50 }
  0xd3   : > { %v1790_v8 = vadd.f32 %v413_v41, %v1769_v1  ;;  %v1804_v15 = vadd.f32 %v442_v42, %v1769_v1 }
  0xd5   : > { %v1822_v26 = vmul.f32 0.2, %v1790_v8  ;;  %v526_v37 = vmul.f32 0.2, %v1804_v15 }
  0xd9   : > { %v1747_v44 = vpop.f32.mrf.mxu2  ;;  %v1749_v45 = vpop.f32.mrf.mxu3 }
  0xda   : > { %v416_v46 = vpop.f32.mrf.mxu0  ;;  %v445_v47 = vpop.f32.mrf.mxu1 }
  0xdb   : > { %v1793_v9 = vadd.f32 %v416_v46, %v1745_v43  ;;  %v446_v16 = vadd.f32 %v445_v47, %v1745_v43  ;;  %v1830_v46 = vadd.f32 %v498_v40, %v324_v50 }
  0xdd   : > { %v529_v27 = vmul.f32 0.2, %v1793_v9  ;;  %v530_v41 = vmul.f32 0.2, %v446_v16 }
  0xdf   : > { %v561_v55 = vmax.f32 %v1793_v9, %v529_v27  ;;  %v562_v25 = vmax.f32 %v446_v16, %v530_v41 }
  0xe1   : > { %v1755_v51 = vpop.f32.mrf.mxu2  ;;  %v1757_v52 = vpop.f32.mrf.mxu3 }
  0xe2   : > { %v418_v53 = vpop.f32.mrf.mxu0  ;;  %v447_v54 = vpop.f32.mrf.mxu1  ;;  %v475_v40 = vadd.f32 %v1755_v51, %v1745_v43  ;;  %v504_v50 = vadd.f32 %v1757_v52, %v1745_v43  ;;  %v557_v51 = vmax.f32 %v1790_v8, %v1822_v26  ;;  %v472_v43 = vadd.f32 %v1747_v44, %v1769_v1 }
  0xe3   : > { %v419_v17 = vadd.f32 %v418_v53, %v1753_v49  ;;  %v448_v21 = vadd.f32 %v447_v54, %v1753_v49 }
  0xe5   : > { %v533_v42 = vmul.f32 0.2, %v419_v17  ;;  %v534_v47 = vmul.f32 0.2, %v448_v21 }
  0xe7   : > { %v565_v27 = vmax.f32 %v419_v17, %v533_v42  ;;  %v523_v42 = vmul.f32 0.2, %v1827_v36 }
  0xe9   : > { %v476_v59 = vpop.f32.mrf.mxu2  ;;  %v505_v60 = vpop.f32.mrf.mxu3 }
  0xea   : > { %v421_v63 = vpop.f32.mrf.mxu0  ;;  %v450_v0 = vpop.f32.mrf.mxu1  ;;  %v506_v9 = vadd.f32 %v505_v60, %v1753_v49  ;;  %v558_v60 = vmax.f32 %v1804_v15, %v526_v37  ;;  %v550_v37 = vmax.f32 %v1781_v5, %v1814_v20 }
  0xeb   : > { %v422_v10 = vadd.f32 %v421_v63, %v1743_v38  ;;  %v451_v11 = vadd.f32 %v450_v0, %v1743_v38  ;;  %v1834_v63 = vadd.f32 %v476_v59, %v1753_v49  ;;  %v566_v59 = vmax.f32 %v448_v21, %v534_v47 }
  0xec   : > { %v501_v49 = vadd.f32 %v1749_v45, %v1769_v1  ;;  %v531_v21 = vmul.f32 0.2, %v475_v40  ;;  %v467_v45 = vadd.f32 %v1739_v34, %v1763_v58  ;;  %v496_v1 = vadd.f32 %v1741_v35, %v1763_v58 }
  0xed   : > { %v537_v30 = vmul.f32 0.2, %v422_v10  ;;  %v538_v31 = vmul.f32 0.2, %v451_v11  ;;  %v535_v52 = vmul.f32 0.2, %v1834_v63  ;;  %v2181_v34 = vmax.f32 %v1765_v61, %v1784_v6 }
  0xee   : > { %v2182_v35 = vmax.f32 %v1767_v62, %v1787_v7  ;;  %v524_v47 = vmul.f32 0.2, %v1830_v46  ;;  %v2183_v62 = vmax.f32 %v1759_v56, %v1772_v2  ;;  %v1437_v56 = vld [vmem:[%s2174_s3] sm:$0xff] }
  0xef   : > { %v569_v39 = vmax.f32 %v422_v10, %v537_v30  ;;  %v528_v30 = vmul.f32 0.2, %v501_v49  ;;  %v567_v15 = vmax.f32 %v1834_v63, %v535_v52  ;;  %v597_v41 = vpack.c.bf16 %v557_v51, %v2181_v34  ;;  %v1443_v51 = vld [vmem:[%s2174_s3 + $0x30] sm:$0xff] }
  0xf0   : > { %v598_v58 = vpack.c.bf16 %v558_v60, %v2182_v35 }
  0xf1   : > { %v479_v22 = vpop.f32.mrf.mxu2  ;;  %v508_v23 = vpop.f32.mrf.mxu3  ;;  %v560_v20 = vmax.f32 %v501_v49, %v528_v30 }
  0xf2   : > { %v423_v28 = vpop.f32.mrf.mxu0  ;;  %v452_v29 = vpop.f32.mrf.mxu1  ;;  %v480_v0 = vadd.f32 %v479_v22, %v1743_v38 }
  0xf3   : > { %v424_v32 = vadd.f32 %v423_v28, %v1751_v48  ;;  %v453_v33 = vadd.f32 %v452_v29, %v1751_v48  ;;  %v509_v28 = vadd.f32 %v508_v23, %v1743_v38  ;;  %v570_v29 = vmax.f32 %v451_v11, %v538_v31 }
  0xf4   : > { %v539_v38 = vmul.f32 0.2, %v480_v0  ;;  %v602_v23 = vpack.c.bf16 %v566_v59, %v562_v25  ;;  %v549_v25 = vmax.f32 %v1778_v4, %v1811_v19  ;;  %v519_v4 = vmul.f32 0.2, %v467_v45 }
  0xf5   : > { %v541_v53 = vmul.f32 0.2, %v424_v32  ;;  %v542_v54 = vmul.f32 0.2, %v453_v33  ;;  %v540_v10 = vmul.f32 0.2, %v509_v28 }
  0xf6   : > { %v571_v8 = vmax.f32 %v480_v0, %v539_v38  ;;  %v520_v19 = vmul.f32 0.2, %v496_v1  ;;  %v593_v7 = vpack.c.bf16 %v549_v25, %v2183_v62  ;;  %v2185_v0 = vld [vmem:[#allocation2_spill] sm:$0xff]  ;;  %v1439_v38 = vld [vmem:[%s2174_s3 + $0x10] sm:$0xff] }
  0xf7   : > { %v573_v13 = vmax.f32 %v424_v32, %v541_v53  ;;  %v574_v12 = vmax.f32 %v453_v33, %v542_v54  ;;  %v563_v53 = vmax.f32 %v475_v40, %v531_v21  ;;  %v555_v40 = vmax.f32 %v1827_v36, %v523_v42 }
  0xf8   : > { %v552_v2 = vmax.f32 %v496_v1, %v520_v19 }
  0xf9   : > { %v481_v24 = vpop.f32.mrf.mxu2  ;;  %v510_v18 = vpop.f32.mrf.mxu3  ;;  %v605_v22 = vpack.c.bf16 %v573_v13, %v569_v39  ;;  %v606_v14 = vpack.c.bf16 %v574_v12, %v570_v29  ;;  %v536_v12 = vmul.f32 0.2, %v506_v9  ;;  %v603_v61 = vpack.c.bf16 %v567_v15, %v563_v53  ;;  %v2186_v39 = vld [vmem:[#allocation3_spill] sm:$0xff] }
  0xfa   : > { %v482_v11 = vadd.f32 %v481_v24, %v1751_v48  ;;  %v511_v16 = vadd.f32 %v510_v18, %v1751_v48  ;;  %v532_v48 = vmul.f32 0.2, %v504_v50  ;;  %v601_v18 = vpack.c.bf16 %v565_v27, %v561_v55 }
  0xfb   : > { %678 = vmatpush.bf16.msrb.mxu0 %v605_v22  ;;  %727 = vmatpush.bf16.msrb.mxu1 %v606_v14  ;;  %v572_v24 = vmax.f32 %v509_v28, %v540_v10  ;;  %v527_v14 = vmul.f32 0.2, %v472_v43  ;;  %v568_v31 = vmax.f32 %v506_v9, %v536_v12  ;;  %v2184_v55 = vmax.f32 %v1761_v57, %v1775_v3  ;;  %v1438_v22 = vld [vmem:[%s2174_s3 + $0x8] sm:$0xff]  ;;  %v1440_v10 = vld [vmem:[%s2174_s3 + $0x18] sm:$0xff] }
  0xfc   : > { %v543_v13 = vmul.f32 0.2, %v482_v11  ;;  %v544_v17 = vmul.f32 0.2, %v511_v16  ;;  %v564_v54 = vmax.f32 %v504_v50, %v532_v48  ;;  %v515_v28 = vmul.f32 0.2, %v2185_v0 }
  0xfd   : > { %v559_v5 = vmax.f32 %v472_v43, %v527_v14  ;;  %v594_v63 = vpack.c.bf16 %v550_v37, %v2184_v55  ;;  %v516_v29 = vmul.f32 0.2, %v2186_v39  ;;  %v556_v50 = vmax.f32 %v1830_v46, %v524_v47  ;;  %v1444_v43 = vld [vmem:[%s2174_s3 + $0x38] sm:$0xff] }
  0xfe   : > { %v575_v26 = vmax.f32 %v482_v11, %v543_v13  ;;  %v576_v44 = vmax.f32 %v511_v16, %v544_v17  ;;  %v604_v6 = vpack.c.bf16 %v568_v31, %v564_v54  ;;  %v551_v9 = vmax.f32 %v467_v45, %v519_v4  ;;  %v1441_v11 = vld [vmem:[%s2174_s3 + $0x20] sm:$0xff]  ;;  %v1442_v16 = vld [vmem:[%s2174_s3 + $0x28] sm:$0xff] }
  0xff   : > { %679 = vmatpush.bf16.msrb.mxu0 %v601_v18  ;;  %728 = vmatpush.bf16.msrb.mxu1 %v602_v23  ;;  %v599_v57 = vpack.c.bf16 %v559_v5, %v555_v40  ;;  %v600_v3 = vpack.c.bf16 %v560_v20, %v556_v50  ;;  %v547_v27 = vmax.f32 %v2185_v0, %v515_v28 }
 0x100   : > { %v607_v32 = vpack.c.bf16 %v575_v26, %v571_v8  ;;  %v608_v33 = vpack.c.bf16 %v576_v44, %v572_v24  ;;  %v548_v59 = vmax.f32 %v2186_v39, %v516_v29 }
 0x101   : > { %v595_v36 = vpack.c.bf16 %v551_v9, %v547_v27 }
 0x102   : > { %776 = vmatpush.bf16.msrb.mxu2 %v607_v32  ;;  %825 = vmatpush.bf16.msrb.mxu3 %v608_v33  ;;  %v596_v46 = vpack.c.bf16 %v552_v2, %v548_v59 }
 0x103   : > { %680 = vmatpush.bf16.msrb.mxu0 %v597_v41  ;;  %729 = vmatpush.bf16.msrb.mxu1 %v598_v58 }
 0x106   : > { %777 = vmatpush.bf16.msrb.mxu2 %v603_v61  ;;  %826 = vmatpush.bf16.msrb.mxu3 %v604_v6 }
 0x107   : > { %681 = vmatpush.bf16.msrb.mxu0 %v593_v7  ;;  %730 = vmatpush.bf16.msrb.mxu1 %v594_v63 }
 0x10a   : > { %778 = vmatpush.bf16.msrb.mxu2 %v599_v57  ;;  %827 = vmatpush.bf16.msrb.mxu3 %v600_v3 }
 0x10b   : > { %1397 = vmatmul.msk.bf16.vlgmr.msrb.gmra.mxu0 %vm649_vm3, %v1437_v56  ;;  %1405 = vmatmul.msk.bf16.vlgmr.msrb.gmra.mxu1 %vm649_vm3, %v1437_v56 }
 0x10e   : > { %779 = vmatpush.bf16.msrb.mxu2 %v595_v36  ;;  %828 = vmatpush.bf16.msrb.mxu3 %v596_v46 }
 0x111   : > { %1413 = vmatmul.msk.bf16.vlgmr.msrb.gmra.mxu2 %vm649_vm3, %v1437_v56  ;;  %1421 = vmatmul.msk.bf16.vlgmr.msrb.gmra.mxu3 %vm649_vm3, %v1437_v56 }
 0x11b   : > { %1398 = vmatmul.msk.bf16.gmra.mxu0 %vm649_vm3, %v1438_v22  ;;  %1406 = vmatmul.msk.bf16.gmra.mxu1 %vm649_vm3, %v1438_v22 }
 0x121   : > { %1414 = vmatmul.msk.bf16.gmra.mxu2 %vm649_vm3, %v1438_v22  ;;  %1422 = vmatmul.msk.bf16.gmra.mxu3 %vm649_vm3, %v1438_v22 }
 0x12b   : > { %1399 = vmatmul.msk.bf16.gmra.mxu0 %vm649_vm3, %v1439_v38  ;;  %1407 = vmatmul.msk.bf16.gmra.mxu1 %vm649_vm3, %v1439_v38 }
 0x131   : > { %1415 = vmatmul.msk.bf16.gmra.mxu2 %vm649_vm3, %v1439_v38  ;;  %1423 = vmatmul.msk.bf16.gmra.mxu3 %vm649_vm3, %v1439_v38 }
 0x13b   : > { %1400 = vmatmul.msk.bf16.gmra.mxu0 %vm649_vm3, %v1440_v10  ;;  %1408 = vmatmul.msk.bf16.gmra.mxu1 %vm649_vm3, %v1440_v10 }
 0x141   : > { %1416 = vmatmul.msk.bf16.gmra.mxu2 %vm649_vm3, %v1440_v10  ;;  %1424 = vmatmul.msk.bf16.gmra.mxu3 %vm649_vm3, %v1440_v10 }
 0x14b   : > { %1401 = vmatmul.msk.bf16.gmra.mxu0 %vm649_vm3, %v1441_v11  ;;  %1409 = vmatmul.msk.bf16.gmra.mxu1 %vm649_vm3, %v1441_v11 }
 0x151   : > { %1417 = vmatmul.msk.bf16.gmra.mxu2 %vm649_vm3, %v1441_v11  ;;  %1425 = vmatmul.msk.bf16.gmra.mxu3 %vm649_vm3, %v1441_v11 }
 0x15b   : > { %1402 = vmatmul.msk.bf16.gmra.mxu0 %vm649_vm3, %v1442_v16  ;;  %1410 = vmatmul.msk.bf16.gmra.mxu1 %vm649_vm3, %v1442_v16 }
 0x161   : > { %1418 = vmatmul.msk.bf16.gmra.mxu2 %vm649_vm3, %v1442_v16  ;;  %1426 = vmatmul.msk.bf16.gmra.mxu3 %vm649_vm3, %v1442_v16 }
 0x16b   : > { %1403 = vmatmul.msk.bf16.gmra.mxu0 %vm649_vm3, %v1443_v51  ;;  %1411 = vmatmul.msk.bf16.gmra.mxu1 %vm649_vm3, %v1443_v51 }
 0x171   : > { %1419 = vmatmul.msk.bf16.gmra.mxu2 %vm649_vm3, %v1443_v51  ;;  %1427 = vmatmul.msk.bf16.gmra.mxu3 %vm649_vm3, %v1443_v51 }
 0x17b   : > { %1404 = vmatmul.msk.bf16.gmra.mxu0 %vm649_vm3, %v1444_v43  ;;  %1412 = vmatmul.msk.bf16.gmra.mxu1 %vm649_vm3, %v1444_v43 }
 0x181   : > { %1420 = vmatmul.msk.bf16.gmra.mxu2 %vm649_vm3, %v1444_v43  ;;  %1428 = vmatmul.msk.bf16.gmra.mxu3 %vm649_vm3, %v1444_v43 }
 0x188   : > { %v683_v49 = vpop.f32.mrf.mxu0  ;;  %v732_v52 = vpop.f32.mrf.mxu1 }
 0x189   : > { %v973_v13 = vadd.f32 %v732_v52, %v683_v49  ;;  %v1102_v17 = vmul.f32 %v683_v49, %v683_v49  ;;  %v1103_v21 = vmul.f32 %v732_v52, %v732_v52 }
 0x18b   : > { %v1166_v8 = vadd.f32 %v1103_v21, %v1102_v17 }
 0x190   : > { %v685_v60 = vpop.f32.mrf.mxu0  ;;  %v734_v12 = vpop.f32.mrf.mxu1 }
 0x191   : > { %v978_v14 = vadd.f32 %v734_v12, %v685_v60  ;;  %v1106_v32 = vmul.f32 %v685_v60, %v685_v60  ;;  %v1107_v33 = vmul.f32 %v734_v12, %v734_v12 }
 0x193   : > { %v1171_v42 = vadd.f32 %v1107_v33, %v1106_v32 }
 0x194   : > { %v781_v48 = vpop.f32.mrf.mxu2  ;;  %v830_v18 = vpop.f32.mrf.mxu3 }
 0x195   : > { %v974_v23 = vadd.f32 %v973_v13, %v781_v48  ;;  %v1104_v24 = vmul.f32 %v781_v48, %v781_v48  ;;  %v1105_v1 = vmul.f32 %v830_v18, %v830_v18 }
 0x197   : > { %v975_v26 = vadd.f32 %v974_v23, %v830_v18  ;;  %v1167_v30 = vadd.f32 %v1166_v8, %v1104_v24 }
 0x198   : > { %v688_v44 = vpop.f32.mrf.mxu0  ;;  %v737_v45 = vpop.f32.mrf.mxu1 }
 0x199   : > { %976 = vadd.xlane.f32.xlu2 %v975_v26  ;;  %v1168_v41 = vadd.f32 %v1167_v30, %v1105_v1  ;;  %v983_v47 = vadd.f32 %v737_v45, %v688_v44  ;;  %v1110_v53 = vmul.f32 %v688_v44, %v688_v44  ;;  %v1111_v54 = vmul.f32 %v737_v45, %v737_v45 }
 0x19b   : > { %v1176_v6 = vadd.f32 %v1111_v54, %v1110_v53 }
 0x19c   : > { %v783_v15 = vpop.f32.mrf.mxu2  ;;  %v832_v31 = vpop.f32.mrf.mxu3 }
 0x19d   : > { %v979_v25 = vadd.f32 %v978_v14, %v783_v15  ;;  %v1108_v37 = vmul.f32 %v783_v15, %v783_v15  ;;  %v1109_v20 = vmul.f32 %v832_v31, %v832_v31 }
 0x19f   : > { %v980_v34 = vadd.f32 %v979_v25, %v832_v31  ;;  %v1172_v4 = vadd.f32 %v1171_v42, %v1108_v37 }
 0x1a0   : > { %v690_v35 = vpop.f32.mrf.mxu0  ;;  %v739_v58 = vpop.f32.mrf.mxu1 }
 0x1a1   : > { %981 = vadd.xlane.f32.xlu0 %v980_v34  ;;  %1169 = vadd.xlane.f32.xlu2 %v1168_v41  ;;  %v1173_v7 = vadd.f32 %v1172_v4, %v1109_v20  ;;  %v988_v39 = vadd.f32 %v739_v58, %v690_v35  ;;  %v1114_v9 = vmul.f32 %v690_v35, %v690_v35 }
 0x1a2   : > { %v1115_v56 = vmul.f32 %v739_v58, %v739_v58 }
 0x1a4   : > { %v786_v19 = vpop.f32.mrf.mxu2  ;;  %v835_v5 = vpop.f32.mrf.mxu3  ;;  %v1181_v38 = vadd.f32 %v1115_v56, %v1114_v9 }
 0x1a5   : > { %v984_v61 = vadd.f32 %v983_v47, %v786_v19  ;;  %v1112_v62 = vmul.f32 %v786_v19, %v786_v19  ;;  %v1113_v28 = vmul.f32 %v835_v5, %v835_v5 }
 0x1a7   : > { %v985_v55 = vadd.f32 %v984_v61, %v835_v5  ;;  %v1177_v29 = vadd.f32 %v1176_v6, %v1112_v62 }
 0x1a8   : > { %v693_v63 = vpop.f32.mrf.mxu0  ;;  %v742_v0 = vpop.f32.mrf.mxu1 }
 0x1a9   : > { %1174 = vadd.xlane.f32.xlu0 %v1173_v7  ;;  %986 = vadd.xlane.f32.xlu1 %v985_v55  ;;  %v1118_v57 = vmul.f32 %v693_v63, %v693_v63  ;;  %v1119_v27 = vmul.f32 %v742_v0, %v742_v0  ;;  %v1178_v36 = vadd.f32 %v1177_v29, %v1113_v28 }
 0x1aa   : > { %v993_v60 = vadd.f32 %v742_v0, %v693_v63 }
 0x1ab   : > { %v1186_v10 = vadd.f32 %v1119_v27, %v1118_v57 }
 0x1ac   : > { %v788_v40 = vpop.f32.mrf.mxu2  ;;  %v837_v50 = vpop.f32.mrf.mxu3 }
 0x1ad   : > { %v989_v2 = vadd.f32 %v988_v39, %v788_v40  ;;  %v1116_v3 = vmul.f32 %v788_v40, %v788_v40  ;;  %v1117_v43 = vmul.f32 %v837_v50, %v837_v50 }
 0x1af   : > { %v990_v59 = vadd.f32 %v989_v2, %v837_v50  ;;  %v1182_v11 = vadd.f32 %v1181_v38, %v1116_v3 }
 0x1b0   : > { %v695_v46 = vpop.f32.mrf.mxu0  ;;  %v744_v22 = vpop.f32.mrf.mxu1 }
 0x1b1   : > { %991 = vadd.xlane.f32.xlu2 %v990_v59  ;;  %1179 = vadd.xlane.f32.xlu1 %v1178_v36  ;;  %v1183_v12 = vadd.f32 %v1182_v11, %v1117_v43  ;;  %v1122_v48 = vmul.f32 %v695_v46, %v695_v46  ;;  %v1123_v18 = vmul.f32 %v744_v22, %v744_v22 }
 0x1b2   : > { %v998_v24 = vadd.f32 %v744_v22, %v695_v46 }
 0x1b3   : > { %v1191_v45 = vadd.f32 %v1123_v18, %v1122_v48 }
 0x1b4   : > { %v791_v16 = vpop.f32.mrf.mxu2  ;;  %v840_v51 = vpop.f32.mrf.mxu3 }
 0x1b5   : > { %v1120_v49 = vmul.f32 %v791_v16, %v791_v16  ;;  %v1121_v52 = vmul.f32 %v840_v51, %v840_v51  ;;  %v994_v8 = vadd.f32 %v993_v60, %v791_v16 }
 0x1b7   : > { %v1187_v13 = vadd.f32 %v1186_v10, %v1120_v49  ;;  %v995_v30 = vadd.f32 %v994_v8, %v840_v51 }
 0x1b8   : > { %v698_v17 = vpop.f32.mrf.mxu0  ;;  %v747_v21 = vpop.f32.mrf.mxu1 }
 0x1b9   : > { %1184 = vadd.xlane.f32.xlu2 %v1183_v12  ;;  %v1188_v23 = vadd.f32 %v1187_v13, %v1121_v52  ;;  %v1126_v31 = vmul.f32 %v698_v17, %v698_v17  ;;  %v1127_v32 = vmul.f32 %v747_v21, %v747_v21  ;;  %v1003_v34 = vadd.f32 %v747_v21, %v698_v17 }
 0x1bb   : > { %1189 = vadd.xlane.f32.xlu0 %v1188_v23  ;;  %v1196_v58 = vadd.f32 %v1127_v32, %v1126_v31 }
 0x1bc   : > { %v793_v26 = vpop.f32.mrf.mxu2  ;;  %v842_v44 = vpop.f32.mrf.mxu3 }
 0x1bd   : > { %v999_v1 = vadd.f32 %v998_v24, %v793_v26  ;;  %v1124_v14 = vmul.f32 %v793_v26, %v793_v26  ;;  %v1125_v15 = vmul.f32 %v842_v44, %v842_v44 }
 0x1bf   : > { %v1192_v33 = vadd.f32 %v1191_v45, %v1124_v14  ;;  %v1000_v41 = vadd.f32 %v999_v1, %v842_v44 }
 0x1c0   : > { %v700_v25 = vpop.f32.mrf.mxu0  ;;  %v749_v37 = vpop.f32.mrf.mxu1 }
 0x1c1   : > { %996 = vadd.xlane.f32.xlu2 %v995_v30  ;;  %v1193_v35 = vadd.f32 %v1192_v33, %v1125_v15  ;;  %v1130_v61 = vmul.f32 %v700_v25, %v700_v25  ;;  %v1131_v6 = vmul.f32 %v749_v37, %v749_v37  ;;  %v1008_v55 = vadd.f32 %v749_v37, %v700_v25 }
 0x1c3   : > { %1001 = vadd.xlane.f32.xlu0 %v1000_v41  ;;  %1194 = vadd.xlane.f32.xlu1 %v1193_v35  ;;  %v1201_v28 = vadd.f32 %v1131_v6, %v1130_v61 }
 0x1c4   : > { %v796_v42 = vpop.f32.mrf.mxu2  ;;  %v845_v47 = vpop.f32.mrf.mxu3 }
 0x1c5   : > { %v1004_v53 = vadd.f32 %v1003_v34, %v796_v42  ;;  %v1128_v54 = vmul.f32 %v796_v42, %v796_v42  ;;  %v1129_v4 = vmul.f32 %v845_v47, %v845_v47 }
 0x1c7   : > { %v1197_v19 = vadd.f32 %v1196_v58, %v1128_v54  ;;  %v1005_v7 = vadd.f32 %v1004_v53, %v845_v47 }
 0x1c8   : > { %v703_v5 = vpop.f32.mrf.mxu0  ;;  %v752_v20 = vpop.f32.mrf.mxu1 }
 0x1c9   : > { %v1198_v62 = vadd.f32 %v1197_v19, %v1129_v4  ;;  %v1134_v50 = vmul.f32 %v703_v5, %v703_v5  ;;  %v1135_v9 = vmul.f32 %v752_v20, %v752_v20  ;;  %v1013_v3 = vadd.f32 %v752_v20, %v703_v5 }
 0x1cb   : > { %1199 = vadd.xlane.f32.xlu2 %v1198_v62  ;;  %1006 = vadd.xlane.f32.xlu1 %v1005_v7  ;;  %v1206_v36 = vadd.f32 %v1135_v9, %v1134_v50 }
 0x1cc   : > { %v798_v63 = vpop.f32.mrf.mxu2  ;;  %v847_v0 = vpop.f32.mrf.mxu3 }
 0x1cd   : > { %v1009_v39 = vadd.f32 %v1008_v55, %v798_v63  ;;  %v1132_v29 = vmul.f32 %v798_v63, %v798_v63  ;;  %v1133_v40 = vmul.f32 %v847_v0, %v847_v0 }
 0x1cf   : > { %v1202_v56 = vadd.f32 %v1201_v28, %v1132_v29  ;;  %v1010_v27 = vadd.f32 %v1009_v39, %v847_v0 }
 0x1d0   : > { %v705_v2 = vpop.f32.mrf.mxu0  ;;  %v754_v57 = vpop.f32.mrf.mxu1 }
 0x1d1   : > { %v1203_v59 = vadd.f32 %v1202_v56, %v1133_v40  ;;  %v1138_v49 = vmul.f32 %v705_v2, %v705_v2  ;;  %v1139_v52 = vmul.f32 %v754_v57, %v754_v57  ;;  %v1018_v13 = vadd.f32 %v754_v57, %v705_v2 }
 0x1d3   : > { %1011 = vadd.xlane.f32.xlu2 %v1010_v27  ;;  %1204 = vadd.xlane.f32.xlu0 %v1203_v59  ;;  %v1211_v48 = vadd.f32 %v1139_v52, %v1138_v49 }
 0x1d4   : > { %v801_v46 = vpop.f32.mrf.mxu2  ;;  %v850_v22 = vpop.f32.mrf.mxu3 }
 0x1d5   : > { %v1014_v38 = vadd.f32 %v1013_v3, %v801_v46  ;;  %v1136_v10 = vmul.f32 %v801_v46, %v801_v46  ;;  %v1137_v11 = vmul.f32 %v850_v22, %v850_v22 }
 0x1d7   : > { %v1207_v16 = vadd.f32 %v1206_v36, %v1136_v10  ;;  %v1015_v12 = vadd.f32 %v1014_v38, %v850_v22 }
 0x1d8   : > { %v708_v51 = vpop.f32.mrf.mxu0  ;;  %v757_v43 = vpop.f32.mrf.mxu1 }
 0x1d9   : > { %v1208_v60 = vadd.f32 %v1207_v16, %v1137_v11  ;;  %v1142_v24 = vmul.f32 %v708_v51, %v708_v51  ;;  %v1143_v26 = vmul.f32 %v757_v43, %v757_v43  ;;  %v1023_v14 = vadd.f32 %v757_v43, %v708_v51 }
 0x1db   : > { %1209 = vadd.xlane.f32.xlu1 %v1208_v60  ;;  %1016 = vadd.xlane.f32.xlu0 %v1015_v12  ;;  %v1216_v31 = vadd.f32 %v1143_v26, %v1142_v24 }
 0x1dc   : > { %v803_v17 = vpop.f32.mrf.mxu2  ;;  %v852_v21 = vpop.f32.mrf.mxu3 }
 0x1dd   : > { %v1019_v18 = vadd.f32 %v1018_v13, %v803_v17  ;;  %v1140_v23 = vmul.f32 %v803_v17, %v803_v17  ;;  %v1141_v8 = vmul.f32 %v852_v21, %v852_v21 }
 0x1df   : > { %v1212_v44 = vadd.f32 %v1211_v48, %v1140_v23  ;;  %v1020_v30 = vadd.f32 %v1019_v18, %v852_v21 }
 0x1e0   : > { %v710_v45 = vpop.f32.mrf.mxu0  ;;  %v759_v1 = vpop.f32.mrf.mxu1 }
 0x1e1   : > { %v1213_v15 = vadd.f32 %v1212_v44, %v1141_v8  ;;  %v1146_v42 = vmul.f32 %v710_v45, %v710_v45  ;;  %v1147_v47 = vmul.f32 %v759_v1, %v759_v1  ;;  %v1028_v4 = vadd.f32 %v759_v1, %v710_v45 }
 0x1e3   : > { %1021 = vadd.xlane.f32.xlu1 %v1020_v30  ;;  %1214 = vadd.xlane.f32.xlu2 %v1213_v15  ;;  %v1221_v20 = vadd.f32 %v1147_v47, %v1146_v42 }
 0x1e4   : > { %v806_v32 = vpop.f32.mrf.mxu2  ;;  %v855_v33 = vpop.f32.mrf.mxu3 }
 0x1e5   : > { %v1024_v25 = vadd.f32 %v1023_v14, %v806_v32  ;;  %v1144_v37 = vmul.f32 %v806_v32, %v806_v32  ;;  %v1145_v34 = vmul.f32 %v855_v33, %v855_v33  ;;  %v957_v14 = vld [vmem:[%s2175_s4] sm:$0xff] }
 0x1e7   : > { %v1217_v41 = vadd.f32 %v1216_v31, %v1144_v37  ;;  %v1025_v54 = vadd.f32 %v1024_v25, %v855_v33 }
 0x1e8   : > { %v713_v35 = vpop.f32.mrf.mxu0  ;;  %v762_v58 = vpop.f32.mrf.mxu1 }
 0x1e9   : > { %v1218_v53 = vadd.f32 %v1217_v41, %v1145_v34  ;;  %v1150_v7 = vmul.f32 %v713_v35, %v713_v35  ;;  %v1151_v55 = vmul.f32 %v762_v58, %v762_v58  ;;  %v1033_v0 = vadd.f32 %v762_v58, %v713_v35 }
 0x1eb   : > { %1219 = vadd.xlane.f32.xlu0 %v1218_v53  ;;  %1026 = vadd.xlane.f32.xlu2 %v1025_v54  ;;  %v1226_v50 = vadd.f32 %v1151_v55, %v1150_v7 }
 0x1ec   : > { %v808_v19 = vpop.f32.mrf.mxu2  ;;  %v857_v5 = vpop.f32.mrf.mxu3 }
 0x1ed   : > { %v1029_v61 = vadd.f32 %v1028_v4, %v808_v19  ;;  %v1148_v6 = vmul.f32 %v808_v19, %v808_v19  ;;  %v1149_v62 = vmul.f32 %v857_v5, %v857_v5  ;;  %v958_v4 = vld [vmem:[%s2175_s4 + $0x8] sm:$0xff] }
 0x1ef   : > { %v1222_v63 = vadd.f32 %v1221_v20, %v1148_v6  ;;  %v1030_v29 = vadd.f32 %v1029_v61, %v857_v5  ;;  %v1086_v20 = vld [vmem:[%s2176_s5] sm:$0xff] }
 0x1f0   : > { %v715_v28 = vpop.f32.mrf.mxu0  ;;  %v764_v39 = vpop.f32.mrf.mxu1 }
 0x1f1   : > { %v1223_v40 = vadd.f32 %v1222_v63, %v1149_v62  ;;  %v1038_v46 = vadd.f32 %v764_v39, %v715_v28  ;;  %v1154_v49 = vmul.f32 %v715_v28, %v715_v28  ;;  %v1155_v52 = vmul.f32 %v764_v39, %v764_v39  ;;  %v1087_v63 = vld [vmem:[%s2176_s5 + $0x8] sm:$0xff] }
 0x1f3   : > { %1031 = vadd.xlane.f32.xlu0 %v1030_v29  ;;  %1224 = vadd.xlane.f32.xlu1 %v1223_v40  ;;  %v1231_v23 = vadd.f32 %v1155_v52, %v1154_v49 }
 0x1f4   : > { %v811_v9 = vpop.f32.mrf.mxu2  ;;  %v860_v56 = vpop.f32.mrf.mxu3 }
 0x1f5   : > { %v1034_v2 = vadd.f32 %v1033_v0, %v811_v9  ;;  %v1152_v57 = vmul.f32 %v811_v9, %v811_v9  ;;  %v1153_v3 = vmul.f32 %v860_v56, %v860_v56  ;;  %v959_v0 = vld [vmem:[%s2175_s4 + $0x10] sm:$0xff] }
 0x1f6   : > { %v1088_v9 = vld [vmem:[%s2176_s5 + $0x10] sm:$0xff] }
 0x1f7   : > { %v1227_v27 = vadd.f32 %v1226_v50, %v1152_v57  ;;  %v1035_v36 = vadd.f32 %v1034_v2, %v860_v56  ;;  %v960_v50 = vld [vmem:[%s2175_s4 + $0x18] sm:$0xff] }
 0x1f8   : > { %v718_v22 = vpop.f32.mrf.mxu0  ;;  %v767_v38 = vpop.f32.mrf.mxu1 }
 0x1f9   : > { %v1228_v59 = vadd.f32 %v1227_v27, %v1153_v3  ;;  %v1043_v51 = vadd.f32 %v767_v38, %v718_v22  ;;  %v1158_v26 = vmul.f32 %v718_v22, %v718_v22  ;;  %v1159_v44 = vmul.f32 %v767_v38, %v767_v38  ;;  %v1089_v27 = vld [vmem:[%s2176_s5 + $0x18] sm:$0xff] }
 0x1fb   : > { %1229 = vadd.xlane.f32.xlu2 %v1228_v59  ;;  %1036 = vadd.xlane.f32.xlu1 %v1035_v36  ;;  %v1236_v34 = vadd.f32 %v1159_v44, %v1158_v26  ;;  %v1090_v36 = vld [vmem:[%s2176_s5 + $0x20] sm:$0xff] }
 0x1fc   : > { %v813_v10 = vpop.f32.mrf.mxu2  ;;  %v862_v11 = vpop.f32.mrf.mxu3 }
 0x1fd   : > { %v1039_v16 = vadd.f32 %v1038_v46, %v813_v10  ;;  %v1156_v17 = vmul.f32 %v813_v10, %v813_v10  ;;  %v1157_v30 = vmul.f32 %v862_v11, %v862_v11  ;;  %v961_v10 = vld [vmem:[%s2175_s4 + $0x20] sm:$0xff] }
 0x1ff   : > { %v1040_v43 = vadd.f32 %v1039_v16, %v862_v11  ;;  %v1232_v45 = vadd.f32 %v1231_v23, %v1156_v17  ;;  %v962_v16 = vld [vmem:[%s2175_s4 + $0x28] sm:$0xff]  ;;  %v963_v17 = vld [vmem:[%s2175_s4 + $0x30] sm:$0xff] }
 0x200   : > { %v720_v21 = vpop.f32.mrf.mxu0  ;;  %v769_v48 = vpop.f32.mrf.mxu1 }
 0x201   : > { %v1162_v8 = vmul.f32 %v720_v21, %v720_v21  ;;  %v1163_v24 = vmul.f32 %v769_v48, %v769_v48  ;;  %v1048_v1 = vadd.f32 %v769_v48, %v720_v21  ;;  %v1233_v41 = vadd.f32 %v1232_v45, %v1157_v30  ;;  %v965_v30 = vld [vmem:[%s2175_s4 + $0x40] sm:$0xff] }
 0x203   : > { %1041 = vadd.xlane.f32.xlu2 %v1040_v43  ;;  %v1241_v32 = vadd.f32 %v1163_v24, %v1162_v8  ;;  %v964_v8 = vld [vmem:[%s2175_s4 + $0x38] sm:$0xff] }
 0x204   : > { %v816_v60 = vpop.f32.mrf.mxu2  ;;  %v865_v12 = vpop.f32.mrf.mxu3  ;;  %v1093_v24 = vld [vmem:[%s2176_s5 + $0x38] sm:$0xff] }
 0x205   : > { %v1044_v13 = vadd.f32 %v1043_v51, %v816_v60  ;;  %v1160_v58 = vmul.f32 %v816_v60, %v816_v60  ;;  %v1161_v19 = vmul.f32 %v865_v12, %v865_v12  ;;  %v1091_v51 = vld [vmem:[%s2176_s5 + $0x28] sm:$0xff] }
 0x207   : > { %v1045_v18 = vadd.f32 %v1044_v13, %v865_v12  ;;  %v1237_v5 = vadd.f32 %v1236_v34, %v1160_v58  ;;  %v1092_v13 = vld [vmem:[%s2176_s5 + $0x30] sm:$0xff] }
 0x209   : > { %1046 = vadd.xlane.f32.xlu0 %v1045_v18  ;;  %v1238_v55 = vadd.f32 %v1237_v5, %v1161_v19  ;;  %v968_v5 = vld [vmem:[%s2175_s4 + $0x58] sm:$0xff] }
 0x20c   : > { %v818_v15 = vpop.f32.mrf.mxu2  ;;  %v867_v31 = vpop.f32.mrf.mxu3 }
 0x20d   : > { %v1049_v33 = vadd.f32 %v1048_v1, %v818_v15  ;;  %v1164_v25 = vmul.f32 %v818_v15, %v818_v15  ;;  %v977_v37 = vpop.xlane.xlu2 %976  ;;  %v1165_v53 = vmul.f32 %v867_v31, %v867_v31 }
 0x20e   : > { %v1053_v35 = vadd.f32 %v977_v37, %v957_v14  ;;  %v1094_v14 = vld [vmem:[%s2176_s5 + $0x40] sm:$0xff]  ;;  %v1095_v37 = vld [vmem:[%s2176_s5 + $0x48] sm:$0xff] }
 0x20f   : > { %v1242_v42 = vadd.f32 %v1241_v32, %v1164_v25  ;;  %v1050_v47 = vadd.f32 %v1049_v33, %v867_v31  ;;  %v966_v25 = vld [vmem:[%s2175_s4 + $0x48] sm:$0xff] }
 0x210   : > { %1070 = vst.msk [vmem:[%s2175_s4] sm:$0xff] %vm1069_vm4, %v1053_v35 }
 0x211   : > { %1234 = vadd.xlane.f32.xlu0 %v1233_v41  ;;  %1051 = vadd.xlane.f32.xlu1 %v1050_v47  ;;  %v1243_v54 = vadd.f32 %v1242_v42, %v1165_v53  ;;  %v1096_v42 = vld [vmem:[%s2176_s5 + $0x50] sm:$0xff] }
 0x212   : > { %v967_v47 = vld [vmem:[%s2175_s4 + $0x50] sm:$0xff] }
 0x213   : > { %1244 = vadd.xlane.f32.xlu2 %v1243_v54 }
 0x214   : > { %v982_v61 = vpop.xlane.xlu0 %981 }
 0x215   : > { %v1054_v6 = vadd.f32 %v982_v61, %v958_v4  ;;  %v1170_v62 = vpop.xlane.xlu2 %1169 }
 0x216   : > { %v1246_v7 = vadd.f32 %v1170_v62, %v1086_v20  ;;  %v1097_v20 = vld [vmem:[%s2176_s5 + $0x58] sm:$0xff] }
 0x217   : > { %1071 = vst.msk [vmem:[%s2175_s4 + $0x8] sm:$0xff] %vm1069_vm4, %v1054_v6 }
 0x218   : > { %1262 = vst.msk [vmem:[%s2176_s5] sm:$0xff] %vm1069_vm4, %v1246_v7 }
 0x219   : > { %1239 = vadd.xlane.f32.xlu1 %v1238_v55  ;;  %v1098_v55 = vld [vmem:[%s2176_s5 + $0x60] sm:$0xff] }
 0x21c   : > { %v1175_v28 = vpop.xlane.xlu0 %1174  ;;  %v987_v39 = vpop.xlane.xlu1 %986 }
 0x21d   : > { %v1247_v29 = vadd.f32 %v1175_v28, %v1087_v63  ;;  %v1055_v40 = vadd.f32 %v987_v39, %v959_v0  ;;  %v969_v63 = vld [vmem:[%s2175_s4 + $0x60] sm:$0xff] }
 0x21f   : > { %1263 = vst.msk [vmem:[%s2176_s5 + $0x8] sm:$0xff] %vm1069_vm4, %v1247_v29 }
 0x220   : > { %1072 = vst.msk [vmem:[%s2175_s4 + $0x10] sm:$0xff] %vm1069_vm4, %v1055_v40  ;;  %v970_v40 = vld [vmem:[%s2175_s4 + $0x68] sm:$0xff] }
 0x224   : > { %v992_v56 = vpop.xlane.xlu2 %991  ;;  %v1180_v2 = vpop.xlane.xlu1 %1179 }
 0x225   : > { %v1056_v57 = vadd.f32 %v992_v56, %v960_v50  ;;  %v1248_v3 = vadd.f32 %v1180_v2, %v1088_v9  ;;  %v971_v56 = vld [vmem:[%s2175_s4 + $0x70] sm:$0xff] }
 0x227   : > { %1073 = vst.msk [vmem:[%s2175_s4 + $0x18] sm:$0xff] %vm1069_vm4, %v1056_v57 }
 0x228   : > { %1264 = vst.msk [vmem:[%s2176_s5 + $0x10] sm:$0xff] %vm1069_vm4, %v1248_v3  ;;  %v1099_v3 = vld [vmem:[%s2176_s5 + $0x68] sm:$0xff] }
 0x22c   : > { %v1185_v59 = vpop.xlane.xlu2 %1184 }
 0x22d   : > { %v1249_v46 = vadd.f32 %v1185_v59, %v1089_v27  ;;  %v972_v27 = vld [vmem:[%s2175_s4 + $0x78] sm:$0xff] }
 0x22e   : > { %v1190_v22 = vpop.xlane.xlu0 %1189 }
 0x22f   : > { %1265 = vst.msk [vmem:[%s2176_s5 + $0x18] sm:$0xff] %vm1069_vm4, %v1249_v46  ;;  %v1250_v38 = vadd.f32 %v1190_v22, %v1090_v36  ;;  %v1101_v46 = vld [vmem:[%s2176_s5 + $0x78] sm:$0xff] }
 0x231   : > { %1266 = vst.msk [vmem:[%s2176_s5 + $0x20] sm:$0xff] %vm1069_vm4, %v1250_v38 }
 0x234   : > { %v997_v11 = vpop.xlane.xlu2 %996 }
 0x235   : > { %v1057_v43 = vadd.f32 %v997_v11, %v961_v10 }
 0x236   : > { %v1002_v49 = vpop.xlane.xlu0 %1001  ;;  %v1195_v52 = vpop.xlane.xlu1 %1194 }
 0x237   : > { %1074 = vst.msk [vmem:[%s2175_s4 + $0x20] sm:$0xff] %vm1069_vm4, %v1057_v43  ;;  %v1058_v60 = vadd.f32 %v1002_v49, %v962_v16  ;;  %v1251_v12 = vadd.f32 %v1195_v52, %v1091_v51  ;;  %v1100_v16 = vld [vmem:[%s2176_s5 + $0x70] sm:$0xff] }
 0x239   : > { %1075 = vst.msk [vmem:[%s2175_s4 + $0x28] sm:$0xff] %vm1069_vm4, %v1058_v60 }
 0x23a   : > { %1267 = vst.msk [vmem:[%s2176_s5 + $0x28] sm:$0xff] %vm1069_vm4, %v1251_v12 }
 0x23e   : > { %v1200_v21 = vpop.xlane.xlu2 %1199  ;;  %v1007_v48 = vpop.xlane.xlu1 %1006 }
 0x23f   : > { %v1252_v18 = vadd.f32 %v1200_v21, %v1092_v13  ;;  %v1059_v23 = vadd.f32 %v1007_v48, %v963_v17 }
 0x241   : > { %1268 = vst.msk [vmem:[%s2176_s5 + $0x30] sm:$0xff] %vm1069_vm4, %v1252_v18 }
 0x242   : > { %1076 = vst.msk [vmem:[%s2175_s4 + $0x30] sm:$0xff] %vm1069_vm4, %v1059_v23 }
 0x246   : > { %v1012_v26 = vpop.xlane.xlu2 %1011  ;;  %v1205_v44 = vpop.xlane.xlu0 %1204 }
 0x247   : > { %v1060_v45 = vadd.f32 %v1012_v26, %v964_v8  ;;  %v1253_v1 = vadd.f32 %v1205_v44, %v1093_v24 }
 0x249   : > { %1077 = vst.msk [vmem:[%s2175_s4 + $0x38] sm:$0xff] %vm1069_vm4, %v1060_v45 }
 0x24a   : > { %1269 = vst.msk [vmem:[%s2176_s5 + $0x38] sm:$0xff] %vm1069_vm4, %v1253_v1 }
 0x24e   : > { %v1210_v15 = vpop.xlane.xlu1 %1209  ;;  %v1017_v31 = vpop.xlane.xlu0 %1016 }
 0x24f   : > { %v1254_v32 = vadd.f32 %v1210_v15, %v1094_v14  ;;  %v1061_v33 = vadd.f32 %v1017_v31, %v965_v30 }
 0x251   : > { %1270 = vst.msk [vmem:[%s2176_s5 + $0x40] sm:$0xff] %vm1069_vm4, %v1254_v32 }
 0x252   : > { %1078 = vst.msk [vmem:[%s2175_s4 + $0x40] sm:$0xff] %vm1069_vm4, %v1061_v33 }
 0x256   : > { %v1022_v34 = vpop.xlane.xlu1 %1021  ;;  %v1215_v41 = vpop.xlane.xlu2 %1214 }
 0x257   : > { %v1062_v35 = vadd.f32 %v1022_v34, %v966_v25  ;;  %v1255_v58 = vadd.f32 %v1215_v41, %v1095_v37 }
 0x259   : > { %1079 = vst.msk [vmem:[%s2175_s4 + $0x48] sm:$0xff] %vm1069_vm4, %v1062_v35 }
 0x25a   : > { %1271 = vst.msk [vmem:[%s2176_s5 + $0x48] sm:$0xff] %vm1069_vm4, %v1255_v58 }
 0x25e   : > { %v1220_v53 = vpop.xlane.xlu0 %1219  ;;  %v1027_v54 = vpop.xlane.xlu2 %1026 }
 0x25f   : > { %v1256_v4 = vadd.f32 %v1220_v53, %v1096_v42  ;;  %v1063_v19 = vadd.f32 %v1027_v54, %v967_v47 }
 0x261   : > { %1272 = vst.msk [vmem:[%s2176_s5 + $0x50] sm:$0xff] %vm1069_vm4, %v1256_v4 }
 0x262   : > { %1080 = vst.msk [vmem:[%s2175_s4 + $0x50] sm:$0xff] %vm1069_vm4, %v1063_v19 }
 0x266   : > { %v1032_v61 = vpop.xlane.xlu0 %1031  ;;  %v1225_v6 = vpop.xlane.xlu1 %1224 }
 0x267   : > { %v1064_v62 = vadd.f32 %v1032_v61, %v968_v5  ;;  %v1257_v7 = vadd.f32 %v1225_v6, %v1097_v20 }
 0x269   : > { %1081 = vst.msk [vmem:[%s2175_s4 + $0x58] sm:$0xff] %vm1069_vm4, %v1064_v62 }
 0x26a   : > { %1273 = vst.msk [vmem:[%s2176_s5 + $0x58] sm:$0xff] %vm1069_vm4, %v1257_v7 }
 0x26e   : > { %v1230_v0 = vpop.xlane.xlu2 %1229  ;;  %v1037_v28 = vpop.xlane.xlu1 %1036 }
 0x26f   : > { %v1258_v39 = vadd.f32 %v1230_v0, %v1098_v55  ;;  %v1065_v29 = vadd.f32 %v1037_v28, %v969_v63 }
 0x271   : > { %1274 = vst.msk [vmem:[%s2176_s5 + $0x60] sm:$0xff] %vm1069_vm4, %v1258_v39 }
 0x272   : > { %1082 = vst.msk [vmem:[%s2175_s4 + $0x60] sm:$0xff] %vm1069_vm4, %v1065_v29 }
 0x276   : > { %v1042_v50 = vpop.xlane.xlu2 %1041 }
 0x277   : > { %v1066_v9 = vadd.f32 %v1042_v50, %v970_v40 }
 0x279   : > { %1083 = vst.msk [vmem:[%s2175_s4 + $0x68] sm:$0xff] %vm1069_vm4, %v1066_v9 }
 0x27c   : > { %v1047_v2 = vpop.xlane.xlu0 %1046 }
 0x27d   : > { %v1067_v57 = vadd.f32 %v1047_v2, %v971_v56 }
 0x27f   : > { %1084 = vst.msk [vmem:[%s2175_s4 + $0x70] sm:$0xff] %vm1069_vm4, %v1067_v57 }
 0x284   : > { %v1235_v59 = vpop.xlane.xlu0 %1234  ;;  %v1052_v36 = vpop.xlane.xlu1 %1051 }
 0x285   : > { %v1259_v22 = vadd.f32 %v1235_v59, %v1099_v3  ;;  %v1068_v38 = vadd.f32 %v1052_v36, %v972_v27 }
 0x286   : > { %v1245_v10 = vpop.xlane.xlu2 %1244 }
 0x287   : > { %1275 = vst.msk [vmem:[%s2176_s5 + $0x68] sm:$0xff] %vm1069_vm4, %v1259_v22  ;;  %v1261_v11 = vadd.f32 %v1245_v10, %v1101_v46 }
 0x288   : > { %1085 = vst.msk [vmem:[%s2175_s4 + $0x78] sm:$0xff] %vm1069_vm4, %v1068_v38 }
 0x289   : > { %1277 = vst.msk [vmem:[%s2176_s5 + $0x78] sm:$0xff] %vm1069_vm4, %v1261_v11 }
 0x28c   : > { %v1240_v51 = vpop.xlane.xlu1 %1239 }
 0x28d   : > { %v1260_v43 = vadd.f32 %v1240_v51, %v1100_v16 }
 0x28f   : > { %1276 = vst.msk [vmem:[%s2176_s5 + $0x70] sm:$0xff] %vm1069_vm4, %v1260_v43 }
 0x290 PF: > { %s16_s20 = sadd.s32 1, %s1496_s20   ;;  %s2187_s18 = smov %s1492_s19 }
 0x291   : > { %p13_p6 = scmp.ge.s32.totalorder %s16_s20, 4   ;;  %s2188_s19 = smov %s2190_s21 }
 0x293   :  { %15 = sbr.rel (!%p13_p6) target bundleno = 2 (0x2), region = 75 }

// kernel: pixel_discriminator_forward.3
= control target key start
LH: loop header
LB: loop body
LE: loop exit
PB: predicated region body
PF: predicated region fallthrough
CT: control target
= control target key end

     0   :  { %s1755_s24 = smov 0   ;;  %s1757_s25 = smov 0   ;;  %s2420_s0 = inlined_call_operand.vmem [shape: f32[2,4,512], index: 0, kind: input, shape index: {}]   ;;  %s2421_s1 = inlined_call_operand.vmem [shape: bf16[64,4], index: 1, kind: input, shape index: {}]   ;;  %s2422_s2 = inlined_call_operand.vmem [shape: f32[64,1], index: 2, kind: input, shape index: {}]   ;;  %s2423_s3 = inlined_call_operand.vmem [shape: bf16[128,64], index: 3, kind: input, shape index: {}]   ;;  %s2424_s4 = inlined_call_operand.vmem [shape: f32[128,1], index: 4, kind: input, shape index: {}]   ;;  %s2425_s5 = inlined_call_operand.vmem [shape: f32[128,1], index: 5, kind: input, shape index: {}]   ;;  %s2426_s6 = inlined_call_operand.vmem [shape: bf16[1,128], index: 6, kind: input, shape index: {}]   ;;  %s2427_s7 = inlined_call_operand.vmem [shape: f32[2,1,512], index: 7, kind: output, shape index: {}]  }
   0x1   :  { %s1759_s26 = smov 0  }
   0x2 LB: > { %s29_s27 = sadd.s32 1, %s1708_s25  ;;  %p1547_p0 = scmp.ge.s32.totalorder %s1712_s26, 1  ;;  %s1712_s26 = sphi %s1759_s26, %s17_s26   ;;  %s1708_s25 = sphi %s1757_s25, %s2475_s25   ;;  %s1704_s24 = sphi %s1755_s24, %s2474_s24  }
   0x3   : > { %p31_p1 = scmp.ge.s32.totalorder %s29_s27, 2  ;;  %p258_p2 = scmp.lt.s32.totalorder %s1712_s26, 3 }
   0x5   : > { %s2477_s27 = smov (%p31_p1, %s29_s27), 0  ;;  %p259_p3 = pnand %p1547_p0, %p258_p2 }
   0x7   : > { %262 = sbr.rel (%p259_p3) target bundleno = 679 (0x2a7), region = 48 }
   0xc   : > { %v350_v0 = vld [vmem:[%s2422_s2 + $0x30] sm:$0xff]  ;;  %v348_v1 = vld [vmem:[%s2422_s2 + $0x20] sm:$0xff]  ;;  %p298_p4 = scmp.lt.s32.totalorder %s1704_s24, 1  ;;  %v1714_v2 = vmov 0   ;;  %v351_v6 = vld [vmem:[%s2422_s2 + $0x38] sm:$0xff]  ;;  %vm425_vm0 = vcmask 1041408  }
   0xd   : > { %1688 = vset.pattern.permute.xlu1 %v1714_v2  ;;  %1687 = vset.pattern.permute.xlu0 %v1714_v2  ;;  %v346_v3 = vld [vmem:[%s2422_s2 + $0x10] sm:$0xff]  ;;  %v349_v7 = vld [vmem:[%s2422_s2 + $0x28] sm:$0xff]  ;;  %v347_v8 = vld [vmem:[%s2422_s2 + $0x18] sm:$0xff]  ;;  %vm412_vm1 = vcmask 31744   ;;  %vm690_vm2 = vcmask 523264   ;;  %vm1451_vm3 = vcmask 1040384  }
   0xe   : > { %384 = vperm.xlu0 %1687, %v350_v0   ;;  %374 = vperm.xlu1 %1688, %v348_v1   ;;  %s2479_s24 = smov (!%p298_p4, %s1704_s24), 1  ;;  %v345_v9 = vld [vmem:[%s2422_s2 + $0x8] sm:$0xff]  ;;  %v344_v10 = vld [vmem:[%s2422_s2] sm:$0xff]  ;;  %v925_v24 = vld [vmem:[%s2424_s4 + $0x70] sm:$0xff]  ;;  %vm1453_vm4 = vcmask 1042434  }
   0xf   : > { %1689 = vset.pattern.permute.xlu2 %v1714_v2  ;;  %s1649_s11 = sshll.u32 %s2479_s24, 4  ;;  %v1650_v23 = vld [vmem:[%s2421_s1] sm:$0xff]  ;;  %v1085_v25 = vld [vmem:[%s2425_s5 + $0x70] sm:$0xff]  ;;  %v926_v26 = vld [vmem:[%s2424_s4 + $0x78] sm:$0xff]  ;;  %s1550_s20 = sshll.u32 %s2479_s24, 2 }
  0x10   : > { %364 = vperm.xlu2 %1689, %v346_v3   ;;  %s305_s14 = scalar_lea.vmem %s2420_s0, %s1649_s11  ;;  %v1086_v27 = vld [vmem:[%s2425_s5 + $0x78] sm:$0xff]  ;;  %v924_v28 = vld [vmem:[%s2424_s4 + $0x68] sm:$0xff]  ;;  %v923_v29 = vld [vmem:[%s2424_s4 + $0x60] sm:$0xff]  ;;  %s314_s23 = scalar_lea.vmem %s2427_s7, %s1550_s20 }
  0x11   : > { %v317_v4 = vld [vmem:[%s305_s14] sm:$0xff]  ;;  %v318_v5 = vld [vmem:[%s305_s14 + $0x8] sm:$0xff]  ;;  %v921_v32 = vld [vmem:[%s2424_s4 + $0x50] sm:$0xff] }
  0x12   : > { %321 = vst [vmem:[#allocation1] ss:$2 sm:$0xff] %v317_v4  ;;  %v1651_v30 = vld [vmem:[%s2421_s1 + $0x8] sm:$0xff]  ;;  %v1083_v31 = vld [vmem:[%s2425_s5 + $0x60] sm:$0xff]  ;;  %v922_v34 = vld [vmem:[%s2424_s4 + $0x58] sm:$0xff] }
  0x13   : > { %323 = vst [vmem:[#allocation1 + $0x10] ss:$2 sm:$0xff] %v318_v5  ;;  %v1084_v33 = vld [vmem:[%s2425_s5 + $0x68] sm:$0xff]  ;;  %v1082_v35 = vld [vmem:[%s2425_s5 + $0x58] sm:$0xff]  ;;  %v1081_v36 = vld [vmem:[%s2425_s5 + $0x50] sm:$0xff] }
  0x14   : > { %v1652_v37 = vld [vmem:[%s2421_s1 + $0x10] sm:$0xff]  ;;  %v919_v38 = vld [vmem:[%s2424_s4 + $0x40] sm:$0xff]  ;;  %v920_v40 = vld [vmem:[%s2424_s4 + $0x48] sm:$0xff] }
  0x15   : > { %v1079_v39 = vld [vmem:[%s2425_s5 + $0x40] sm:$0xff]  ;;  %v1080_v41 = vld [vmem:[%s2425_s5 + $0x48] sm:$0xff]  ;;  %v918_v42 = vld [vmem:[%s2424_s4 + $0x38] sm:$0xff] }
  0x16   : > { %389 = vperm.xlu0 %1687, %v351_v6   ;;  %379 = vperm.xlu1 %1688, %v349_v7   ;;  %v917_v43 = vld [vmem:[%s2424_s4 + $0x30] sm:$0xff]  ;;  %v1653_v44 = vld [vmem:[%s2421_s1 + $0x18] sm:$0xff]  ;;  %v915_v46 = vld [vmem:[%s2424_s4 + $0x20] sm:$0xff] }
  0x17   : > { %v1077_v45 = vld [vmem:[%s2425_s5 + $0x30] sm:$0xff]  ;;  %v1078_v47 = vld [vmem:[%s2425_s5 + $0x38] sm:$0xff]  ;;  %v916_v48 = vld [vmem:[%s2424_s4 + $0x28] sm:$0xff] }
  0x18   : > { %369 = vperm.xlu2 %1689, %v347_v8   ;;  %v1076_v49 = vld [vmem:[%s2425_s5 + $0x28] sm:$0xff]  ;;  %v1075_v50 = vld [vmem:[%s2425_s5 + $0x20] sm:$0xff]  ;;  %v913_v51 = vld [vmem:[%s2424_s4 + $0x10] sm:$0xff] }
  0x19   : > { %v324_v11 = vld.sshfl [vmem:[#allocation1] sm:$0xff pattern:$0x75316420]  ;;  %v325_v12 = vld.sshfl [vmem:[#allocation1 + $0x8] sm:$0xff pattern:$0x75316420] }
  0x1a   : > { %v332_v13 = vpack.c.bf16 %v324_v11, %v324_v11  ;;  %v333_v14 = vpack.c.bf16 %v325_v12, %v325_v12  ;;  %v326_v15 = vld.sshfl [vmem:[#allocation1 + $0x10] sm:$0xff pattern:$0x75316420]  ;;  %v327_v16 = vld.sshfl [vmem:[#allocation1 + $0x18] sm:$0xff pattern:$0x75316420] }
  0x1b   : > { %v334_v17 = vpack.c.bf16 %v326_v15, %v326_v15  ;;  %v335_v18 = vpack.c.bf16 %v327_v16, %v327_v16  ;;  %v1073_v52 = vld [vmem:[%s2425_s5 + $0x10] sm:$0xff]  ;;  %v914_v53 = vld [vmem:[%s2424_s4 + $0x18] sm:$0xff]  ;;  %v912_v55 = vld [vmem:[%s2424_s4 + $0x8] sm:$0xff] }
  0x1c   : > { %v427_v19 = vsel %vm425_vm0, %v332_v13, 0  ;;  %v430_v20 = vsel %vm425_vm0, %v333_v14, 0  ;;  %v1074_v54 = vld [vmem:[%s2425_s5 + $0x18] sm:$0xff]  ;;  %v911_v56 = vld [vmem:[%s2424_s4] sm:$0xff]  ;;  %v1072_v58 = vld [vmem:[%s2425_s5 + $0x8] sm:$0xff] }
  0x1d   : > { %v433_v21 = vsel %vm425_vm0, %v334_v17, 0  ;;  %v436_v22 = vsel %vm425_vm0, %v335_v18, 0  ;;  %445 = vmatpush.bf16.msra.mxu0 %v427_v19  ;;  %474 = vmatpush.bf16.msra.mxu1 %v430_v20  ;;  %v1071_v57 = vld [vmem:[%s2425_s5] sm:$0xff] }
  0x1e   : > { %359 = vperm.xlu1 %1688, %v345_v9   ;;  %354 = vperm.xlu0 %1687, %v344_v10  }
  0x1f   : > { %503 = vmatpush.bf16.msra.mxu2 %v433_v21  ;;  %532 = vmatpush.bf16.msra.mxu3 %v436_v22 }
  0x20   : > { %999 = vperm.xlu2 %1689, %v925_v24   ;;  %1567 = vmatmul.msk.bf16.vlgmr.msra.gmra.mxu0 %vm412_vm1, %v1650_v23 }
  0x21   : > { %1571 = vmatmul.msk.bf16.vlgmr.msra.gmra.mxu1 %vm412_vm1, %v1650_v23 }
  0x22   : > { %1575 = vmatmul.msk.bf16.vlgmr.msra.gmra.mxu2 %vm412_vm1, %v1650_v23  ;;  %1579 = vmatmul.msk.bf16.vlgmr.msra.gmra.mxu3 %vm412_vm1, %v1650_v23 }
  0x26   : > { %1159 = vperm.xlu1 %1688, %v1085_v25   ;;  %1004 = vperm.xlu0 %1687, %v926_v26  }
  0x28   : > { %1164 = vperm.xlu2 %1689, %v1086_v27  }
  0x2e   : > { %994 = vperm.xlu1 %1688, %v924_v28   ;;  %989 = vperm.xlu0 %1687, %v923_v29  }
  0x30   : > { %1149 = vperm.xlu2 %1689, %v1083_v31   ;;  %1568 = vmatmul.msk.bf16.gmra.mxu0 %vm412_vm1, %v1651_v30 }
  0x31   : > { %1572 = vmatmul.msk.bf16.gmra.mxu1 %vm412_vm1, %v1651_v30 }
  0x32   : > { %1576 = vmatmul.msk.bf16.gmra.mxu2 %vm412_vm1, %v1651_v30  ;;  %1580 = vmatmul.msk.bf16.gmra.mxu3 %vm412_vm1, %v1651_v30 }
  0x36   : > { %979 = vperm.xlu1 %1688, %v921_v32   ;;  %1154 = vperm.xlu0 %1687, %v1084_v33  }
  0x38   : > { %984 = vperm.xlu2 %1689, %v922_v34  }
  0x3e   : > { %1144 = vperm.xlu1 %1688, %v1082_v35   ;;  %1139 = vperm.xlu0 %1687, %v1081_v36  }
  0x40   : > { %969 = vperm.xlu2 %1689, %v919_v38   ;;  %1569 = vmatmul.msk.bf16.gmra.mxu0 %vm412_vm1, %v1652_v37 }
  0x41   : > { %1573 = vmatmul.msk.bf16.gmra.mxu1 %vm412_vm1, %v1652_v37 }
  0x42   : > { %1577 = vmatmul.msk.bf16.gmra.mxu2 %vm412_vm1, %v1652_v37  ;;  %1581 = vmatmul.msk.bf16.gmra.mxu3 %vm412_vm1, %v1652_v37 }
  0x46   : > { %1129 = vperm.xlu1 %1688, %v1079_v39   ;;  %974 = vperm.xlu0 %1687, %v920_v40  }
  0x48   : > { %1134 = vperm.xlu2 %1689, %v1080_v41  }
  0x4e   : > { %964 = vperm.xlu1 %1688, %v918_v42   ;;  %959 = vperm.xlu0 %1687, %v917_v43  }
  0x50   : > { %1119 = vperm.xlu2 %1689, %v1077_v45   ;;  %1570 = vmatmul.msk.bf16.gmra.mxu0 %vm412_vm1, %v1653_v44 }
  0x51   : > { %1574 = vmatmul.msk.bf16.gmra.mxu1 %vm412_vm1, %v1653_v44 }
  0x52   : > { %1578 = vmatmul.msk.bf16.gmra.mxu2 %vm412_vm1, %v1653_v44  ;;  %1582 = vmatmul.msk.bf16.gmra.mxu3 %vm412_vm1, %v1653_v44 }
  0x56   : > { %949 = vperm.xlu1 %1688, %v915_v46   ;;  %1124 = vperm.xlu0 %1687, %v1078_v47  }
  0x58   : > { %954 = vperm.xlu2 %1689, %v916_v48  }
  0x5e   : > { %1114 = vperm.xlu1 %1688, %v1076_v49   ;;  %1109 = vperm.xlu0 %1687, %v1075_v50  }
  0x60   : > { %939 = vperm.xlu2 %1689, %v913_v51  }
  0x66   : > { %1099 = vperm.xlu1 %1688, %v1073_v52   ;;  %944 = vperm.xlu0 %1687, %v914_v53  }
  0x68   : > { %1104 = vperm.xlu2 %1689, %v1074_v54  }
  0x6a   : > { %v365_v21 = vpop.permute.xlu2 %364 }
  0x6e   : > { %934 = vperm.xlu1 %1688, %v912_v55   ;;  %929 = vperm.xlu0 %1687, %v911_v56  }
  0x70   : > { %1089 = vperm.xlu2 %1689, %v1071_v57  }
  0x72   : > { %v1967_v34 = vpop.permute.xlu2 %369 }
  0x76   : > { %1094 = vperm.xlu0 %1687, %v1072_v58  }
  0x80   : > { %v1935_v5 = vpop.permute.xlu0 %384  ;;  %v1937_v10 = vpop.permute.xlu1 %374 }
  0x88   : > { %v1943_v15 = vpop.permute.xlu0 %389  ;;  %v1945_v16 = vpop.permute.xlu1 %379 }
  0x90   : > { %v355_v22 = vpop.permute.xlu0 %354  ;;  %v1965_v33 = vpop.permute.xlu1 %359 }
  0x9d   : > { %v447_v59 = vpop.f32.mrf.mxu0 }
  0x9e   : > { %v476_v60 = vpop.f32.mrf.mxu1  ;;  %v1951_v23 = vadd.f32 %v447_v59, %v355_v22 }
  0x9f   : > { %v1953_v24 = vadd.f32 %v476_v60, %v355_v22 }
  0xa0   : > { %v1960_v31 = vmul.f32 0.2, %v1951_v23 }
  0xa1   : > { %v1963_v32 = vmul.f32 0.2, %v1953_v24 }
  0xa5   : > { %v505_v61 = vpop.f32.mrf.mxu2  ;;  %v534_v62 = vpop.f32.mrf.mxu3 }
  0xa6   : > { %v449_v63 = vpop.f32.mrf.mxu0  ;;  %v478_v0 = vpop.f32.mrf.mxu1  ;;  %v1993_v45 = vadd.f32 %v505_v61, %v355_v22  ;;  %v2000_v49 = vadd.f32 %v534_v62, %v355_v22 }
  0xa7   : > { %v1970_v35 = vadd.f32 %v449_v63, %v1965_v33  ;;  %v1973_v36 = vadd.f32 %v478_v0, %v1965_v33 }
  0xa8   : > { %2430 = vst [vmem:[#allocation2_spill] sm:$0xff] %v1993_v45 }
  0xa9   : > { %2431 = vst [vmem:[#allocation3_spill] sm:$0xff] %v2000_v49  ;;  %v2003_v50 = vmul.f32 0.2, %v1970_v35  ;;  %v2006_v51 = vmul.f32 0.2, %v1973_v36 }
  0xad   : > { %v1931_v1 = vpop.f32.mrf.mxu2  ;;  %v1933_v2 = vpop.f32.mrf.mxu3 }
  0xae   : > { %v452_v3 = vpop.f32.mrf.mxu0  ;;  %v481_v4 = vpop.f32.mrf.mxu1 }
  0xaf   : > { %v1955_v27 = vadd.f32 %v452_v3, %v365_v21  ;;  %v1957_v28 = vadd.f32 %v481_v4, %v365_v21 }
  0xb1   : > { %v1976_v37 = vmul.f32 0.2, %v1955_v27  ;;  %v1979_v38 = vmul.f32 0.2, %v1957_v28 }
  0xb5   : > { %v510_v6 = vpop.f32.mrf.mxu2  ;;  %v539_v7 = vpop.f32.mrf.mxu3 }
  0xb6   : > { %v454_v8 = vpop.f32.mrf.mxu0  ;;  %v483_v9 = vpop.f32.mrf.mxu1  ;;  %v2019_v3 = vadd.f32 %v510_v6, %v365_v21 }
  0xb7   : > { %v1982_v39 = vadd.f32 %v454_v8, %v1967_v34  ;;  %v1996_v46 = vadd.f32 %v483_v9, %v1967_v34 }
  0xb9   : > { %v2014_v57 = vmul.f32 0.2, %v1982_v39  ;;  %v567_v4 = vmul.f32 0.2, %v1996_v46 }
  0xbd   : > { %v1939_v11 = vpop.f32.mrf.mxu2  ;;  %v1941_v12 = vpop.f32.mrf.mxu3 }
  0xbe   : > { %v457_v13 = vpop.f32.mrf.mxu0  ;;  %v486_v14 = vpop.f32.mrf.mxu1 }
  0xbf   : > { %v1985_v40 = vadd.f32 %v457_v13, %v1937_v10  ;;  %v487_v47 = vadd.f32 %v486_v14, %v1937_v10  ;;  %v2022_v13 = vadd.f32 %v539_v7, %v365_v21 }
  0xc1   : > { %v570_v58 = vmul.f32 0.2, %v1985_v40  ;;  %v571_v8 = vmul.f32 0.2, %v487_v47 }
  0xc3   : > { %v602_v22 = vmax.f32 %v1985_v40, %v570_v58  ;;  %v603_v56 = vmax.f32 %v487_v47, %v571_v8  ;;  %v2433_v8 = vmax.f32 %v1957_v28, %v1979_v38 }
  0xc5   : > { %v1947_v17 = vpop.f32.mrf.mxu2  ;;  %v1949_v18 = vpop.f32.mrf.mxu3 }
  0xc6   : > { %v459_v19 = vpop.f32.mrf.mxu0  ;;  %v488_v20 = vpop.f32.mrf.mxu1  ;;  %v516_v7 = vadd.f32 %v1947_v17, %v1937_v10  ;;  %v545_v21 = vadd.f32 %v1949_v18, %v1937_v10  ;;  %v598_v17 = vmax.f32 %v1982_v39, %v2014_v57  ;;  %v513_v10 = vadd.f32 %v1939_v11, %v1967_v34 }
  0xc7   : > { %v460_v48 = vadd.f32 %v459_v19, %v1945_v16  ;;  %v489_v52 = vadd.f32 %v488_v20, %v1945_v16 }
  0xc9   : > { %v574_v9 = vmul.f32 0.2, %v460_v48  ;;  %v575_v14 = vmul.f32 0.2, %v489_v52 }
  0xcb   : > { %v606_v58 = vmax.f32 %v460_v48, %v574_v9  ;;  %v564_v9 = vmul.f32 0.2, %v2019_v3 }
  0xcd   : > { %v517_v25 = vpop.f32.mrf.mxu2  ;;  %v546_v26 = vpop.f32.mrf.mxu3 }
  0xce   : > { %v462_v29 = vpop.f32.mrf.mxu0  ;;  %v491_v30 = vpop.f32.mrf.mxu1  ;;  %v547_v40 = vadd.f32 %v546_v26, %v1945_v16  ;;  %v599_v26 = vmax.f32 %v1996_v46, %v567_v4 }
  0xcf   : > { %v463_v43 = vadd.f32 %v462_v29, %v1935_v5  ;;  %v492_v44 = vadd.f32 %v491_v30, %v1935_v5  ;;  %v2026_v29 = vadd.f32 %v517_v25, %v1945_v16  ;;  %v607_v25 = vmax.f32 %v489_v52, %v575_v14 }
  0xd0   : > { %v542_v16 = vadd.f32 %v1941_v12, %v1967_v34  ;;  %v572_v52 = vmul.f32 0.2, %v516_v7  ;;  %v508_v12 = vadd.f32 %v1931_v1, %v1965_v33  ;;  %v537_v34 = vadd.f32 %v1933_v2, %v1965_v33 }
  0xd1   : > { %v578_v61 = vmul.f32 0.2, %v463_v43  ;;  %v579_v62 = vmul.f32 0.2, %v492_v44  ;;  %v576_v18 = vmul.f32 0.2, %v2026_v29  ;;  %v639_v1 = vpack.c.bf16 %v599_v26, %v2433_v8 }
  0xd2   : > { %v590_v2 = vmax.f32 %v1970_v35, %v2003_v50  ;;  %v591_v33 = vmax.f32 %v1973_v36, %v2006_v51  ;;  %v565_v14 = vmul.f32 0.2, %v2022_v13  ;;  %v2434_v35 = vmax.f32 %v1951_v23, %v1960_v31  ;;  %v1654_v23 = vld [vmem:[%s2423_s3] sm:$0xff] }
  0xd3   : > { %v610_v6 = vmax.f32 %v463_v43, %v578_v61  ;;  %v569_v61 = vmul.f32 0.2, %v542_v16  ;;  %v608_v46 = vmax.f32 %v2026_v29, %v576_v18  ;;  %v2435_v50 = vmax.f32 %v1953_v24, %v1963_v32 }
  0xd4   : > { %v634_v36 = vpack.c.bf16 %v590_v2, %v2434_v35 }
  0xd5   : > { %v520_v53 = vpop.f32.mrf.mxu2  ;;  %v549_v54 = vpop.f32.mrf.mxu3  ;;  %v601_v38 = vmax.f32 %v542_v16, %v569_v61  ;;  %v635_v51 = vpack.c.bf16 %v591_v33, %v2435_v50  ;;  %v1657_v16 = vld [vmem:[%s2423_s3 + $0x18] sm:$0xff]  ;;  %v1660_v61 = vld [vmem:[%s2423_s3 + $0x30] sm:$0xff] }
  0xd6   : > { %v464_v59 = vpop.f32.mrf.mxu0  ;;  %v493_v60 = vpop.f32.mrf.mxu1  ;;  %v521_v30 = vadd.f32 %v520_v53, %v1935_v5 }
  0xd7   : > { %v465_v63 = vadd.f32 %v464_v59, %v1943_v15  ;;  %v494_v0 = vadd.f32 %v493_v60, %v1943_v15  ;;  %v550_v59 = vadd.f32 %v549_v54, %v1935_v5  ;;  %v611_v60 = vmax.f32 %v492_v44, %v579_v62 }
  0xd8   : > { %v580_v5 = vmul.f32 0.2, %v521_v30  ;;  %v643_v54 = vpack.c.bf16 %v607_v25, %v603_v56  ;;  %v2432_v56 = vmax.f32 %v1955_v27, %v1976_v37  ;;  %v560_v27 = vmul.f32 0.2, %v508_v12 }
  0xd9   : > { %v582_v19 = vmul.f32 0.2, %v465_v63  ;;  %v583_v20 = vmul.f32 0.2, %v494_v0  ;;  %v581_v43 = vmul.f32 0.2, %v550_v59 }
  0xda   : > { %v612_v39 = vmax.f32 %v521_v30, %v580_v5  ;;  %v638_v4 = vpack.c.bf16 %v598_v17, %v2432_v56  ;;  %v561_v37 = vmul.f32 0.2, %v537_v34  ;;  %v2436_v30 = vld [vmem:[#allocation2_spill] sm:$0xff]  ;;  %v592_v31 = vmax.f32 %v508_v12, %v560_v27  ;;  %v1656_v5 = vld [vmem:[%s2423_s3 + $0x10] sm:$0xff]  ;;  %v2101_v17 = vpop.permute.xlu1 %1159  ;;  %v1661_v56 = vld [vmem:[%s2423_s3 + $0x38] sm:$0xff] }
  0xdb   : > { %v614_v42 = vmax.f32 %v465_v63, %v582_v19  ;;  %v615_v41 = vmax.f32 %v494_v0, %v583_v20  ;;  %v604_v19 = vmax.f32 %v516_v7, %v572_v52  ;;  %v596_v7 = vmax.f32 %v2019_v3, %v564_v9 }
  0xdc   : > { %v593_v32 = vmax.f32 %v537_v34, %v561_v37 }
  0xdd   : > { %v522_v55 = vpop.f32.mrf.mxu2  ;;  %v551_v49 = vpop.f32.mrf.mxu3  ;;  %v646_v53 = vpack.c.bf16 %v614_v42, %v610_v6  ;;  %v647_v45 = vpack.c.bf16 %v615_v41, %v611_v60  ;;  %v577_v41 = vmul.f32 0.2, %v547_v40  ;;  %v2437_v6 = vld [vmem:[#allocation3_spill] sm:$0xff] }
  0xde   : > { %v523_v44 = vadd.f32 %v522_v55, %v1943_v15  ;;  %v552_v47 = vadd.f32 %v551_v49, %v1943_v15  ;;  %v573_v15 = vmul.f32 0.2, %v545_v21  ;;  %v642_v49 = vpack.c.bf16 %v606_v58, %v602_v22 }
  0xdf   : > { %719 = vmatpush.bf16.msrb.mxu0 %v646_v53  ;;  %768 = vmatpush.bf16.msrb.mxu1 %v647_v45  ;;  %v613_v55 = vmax.f32 %v550_v59, %v581_v43  ;;  %v568_v45 = vmul.f32 0.2, %v513_v10  ;;  %v609_v62 = vmax.f32 %v547_v40, %v577_v41  ;;  %v644_v22 = vpack.c.bf16 %v608_v46, %v604_v19  ;;  %v1655_v53 = vld [vmem:[%s2423_s3 + $0x8] sm:$0xff]  ;;  %v2091_v43 = vpop.permute.xlu2 %999 }
  0xe0   : > { %v584_v42 = vmul.f32 0.2, %v523_v44  ;;  %v585_v48 = vmul.f32 0.2, %v552_v47  ;;  %v605_v20 = vmax.f32 %v545_v21, %v573_v15  ;;  %v556_v59 = vmul.f32 0.2, %v2436_v30 }
  0xe1   : > { %v600_v28 = vmax.f32 %v513_v10, %v568_v45  ;;  %v557_v60 = vmul.f32 0.2, %v2437_v6  ;;  %v597_v21 = vmax.f32 %v2022_v13, %v565_v14 }
  0xe2   : > { %v616_v57 = vmax.f32 %v523_v44, %v584_v42  ;;  %v617_v11 = vmax.f32 %v552_v47, %v585_v48  ;;  %v645_v29 = vpack.c.bf16 %v609_v62, %v605_v20  ;;  %v588_v58 = vmax.f32 %v2436_v30, %v556_v59  ;;  %v2095_v44 = vpop.permute.xlu0 %1004  ;;  %v2112_v26 = vpop.permute.xlu1 %994  ;;  %v1658_v42 = vld [vmem:[%s2423_s3 + $0x20] sm:$0xff] }
  0xe3   : > { %720 = vmatpush.bf16.msrb.mxu0 %v642_v49  ;;  %769 = vmatpush.bf16.msrb.mxu1 %v643_v54  ;;  %v640_v40 = vpack.c.bf16 %v600_v28, %v596_v7  ;;  %v641_v24 = vpack.c.bf16 %v601_v38, %v597_v21  ;;  %v589_v25 = vmax.f32 %v2437_v6, %v557_v60 }
  0xe4   : > { %v648_v63 = vpack.c.bf16 %v616_v57, %v612_v39  ;;  %v649_v0 = vpack.c.bf16 %v617_v11, %v613_v55  ;;  %v636_v3 = vpack.c.bf16 %v592_v31, %v588_v58  ;;  %v1659_v55 = vld [vmem:[%s2423_s3 + $0x28] sm:$0xff] }
  0xe5   : > { %v637_v13 = vpack.c.bf16 %v593_v32, %v589_v25 }
  0xe6   : > { %817 = vmatpush.bf16.msrb.mxu2 %v648_v63  ;;  %866 = vmatpush.bf16.msrb.mxu3 %v649_v0 }
  0xe7   : > { %721 = vmatpush.bf16.msrb.mxu0 %v638_v4  ;;  %770 = vmatpush.bf16.msrb.mxu1 %v639_v1  ;;  %v2099_v47 = vpop.permute.xlu2 %1164 }
  0xea   : > { %818 = vmatpush.bf16.msrb.mxu2 %v644_v22  ;;  %867 = vmatpush.bf16.msrb.mxu3 %v645_v29  ;;  %v2103_v10 = vpop.permute.xlu0 %989  ;;  %v2123_v52 = vpop.permute.xlu1 %979 }
  0xeb   : > { %722 = vmatpush.bf16.msrb.mxu0 %v634_v36  ;;  %771 = vmatpush.bf16.msrb.mxu1 %v635_v51 }
  0xee   : > { %819 = vmatpush.bf16.msrb.mxu2 %v640_v40  ;;  %868 = vmatpush.bf16.msrb.mxu3 %v641_v24 }
  0xef   : > { %1615 = vmatmul.msk.bf16.vlgmr.msrb.gmra.mxu0 %vm690_vm2, %v1654_v23  ;;  %1623 = vmatmul.msk.bf16.vlgmr.msrb.gmra.mxu1 %vm690_vm2, %v1654_v23  ;;  %v2110_v18 = vpop.permute.xlu2 %1149 }
  0xf2   : > { %820 = vmatpush.bf16.msrb.mxu2 %v636_v3  ;;  %869 = vmatpush.bf16.msrb.mxu3 %v637_v13  ;;  %v2114_v41 = vpop.permute.xlu0 %1154  ;;  %v2133_v54 = vpop.permute.xlu1 %1144 }
  0xf5   : > { %1631 = vmatmul.msk.bf16.vlgmr.msrb.gmra.mxu2 %vm690_vm2, %v1654_v23  ;;  %1639 = vmatmul.msk.bf16.vlgmr.msrb.gmra.mxu3 %vm690_vm2, %v1654_v23 }
  0xf7   : > { %v2121_v48 = vpop.permute.xlu2 %984 }
  0xfa   : > { %v2125_v15 = vpop.permute.xlu0 %1139  ;;  %v2144_v11 = vpop.permute.xlu1 %1129 }
  0xff   : > { %1616 = vmatmul.msk.bf16.gmra.mxu0 %vm690_vm2, %v1655_v53  ;;  %1624 = vmatmul.msk.bf16.gmra.mxu1 %vm690_vm2, %v1655_v53  ;;  %v2131_v49 = vpop.permute.xlu2 %969 }
 0x102   : > { %v2135_v39 = vpop.permute.xlu0 %974  ;;  %v2152_v45 = vpop.permute.xlu1 %964 }
 0x105   : > { %1632 = vmatmul.msk.bf16.gmra.mxu2 %vm690_vm2, %v1655_v53  ;;  %1640 = vmatmul.msk.bf16.gmra.mxu3 %vm690_vm2, %v1655_v53 }
 0x107   : > { %v2142_v57 = vpop.permute.xlu2 %1134 }
 0x10a   : > { %v2146_v12 = vpop.permute.xlu0 %959  ;;  %v2163_v63 = vpop.permute.xlu1 %949 }
 0x10f   : > { %1617 = vmatmul.msk.bf16.gmra.mxu0 %vm690_vm2, %v1656_v5  ;;  %1625 = vmatmul.msk.bf16.gmra.mxu1 %vm690_vm2, %v1656_v5  ;;  %v2150_v34 = vpop.permute.xlu2 %1119 }
 0x112   : > { %v2157_v46 = vpop.permute.xlu0 %1124  ;;  %v2174_v8 = vpop.permute.xlu1 %1114 }
 0x115   : > { %1633 = vmatmul.msk.bf16.gmra.mxu2 %vm690_vm2, %v1656_v5  ;;  %1641 = vmatmul.msk.bf16.gmra.mxu3 %vm690_vm2, %v1656_v5 }
 0x117   : > { %v2161_v62 = vpop.permute.xlu2 %954 }
 0x11a   : > { %v2167_v0 = vpop.permute.xlu0 %1109  ;;  %v2184_v33 = vpop.permute.xlu1 %1099 }
 0x11f   : > { %1618 = vmatmul.msk.bf16.gmra.mxu0 %vm690_vm2, %v1657_v16  ;;  %1626 = vmatmul.msk.bf16.gmra.mxu1 %vm690_vm2, %v1657_v16  ;;  %v2172_v4 = vpop.permute.xlu2 %939 }
 0x122   : > { %v2178_v1 = vpop.permute.xlu0 %944  ;;  %v935_v28 = vpop.permute.xlu1 %934 }
 0x125   : > { %1634 = vmatmul.msk.bf16.gmra.mxu2 %vm690_vm2, %v1657_v16  ;;  %1642 = vmatmul.msk.bf16.gmra.mxu3 %vm690_vm2, %v1657_v16 }
 0x127   : > { %v2182_v2 = vpop.permute.xlu2 %1104 }
 0x12a   : > { %v930_v9 = vpop.permute.xlu0 %929 }
 0x12f   : > { %1619 = vmatmul.msk.bf16.gmra.mxu0 %vm690_vm2, %v1658_v42  ;;  %1627 = vmatmul.msk.bf16.gmra.mxu1 %vm690_vm2, %v1658_v42  ;;  %v1090_v37 = vpop.permute.xlu2 %1089 }
 0x132   : > { %v1095_v51 = vpop.permute.xlu0 %1094 }
 0x135   : > { %1635 = vmatmul.msk.bf16.gmra.mxu2 %vm690_vm2, %v1658_v42  ;;  %1643 = vmatmul.msk.bf16.gmra.mxu3 %vm690_vm2, %v1658_v42 }
 0x13f   : > { %1620 = vmatmul.msk.bf16.gmra.mxu0 %vm690_vm2, %v1659_v55  ;;  %1628 = vmatmul.msk.bf16.gmra.mxu1 %vm690_vm2, %v1659_v55 }
 0x145   : > { %1636 = vmatmul.msk.bf16.gmra.mxu2 %vm690_vm2, %v1659_v55  ;;  %1644 = vmatmul.msk.bf16.gmra.mxu3 %vm690_vm2, %v1659_v55 }
 0x14f   : > { %1621 = vmatmul.msk.bf16.gmra.mxu0 %vm690_vm2, %v1660_v61  ;;  %1629 = vmatmul.msk.bf16.gmra.mxu1 %vm690_vm2, %v1660_v61 }
 0x155   : > { %1637 = vmatmul.msk.bf16.gmra.mxu2 %vm690_vm2, %v1660_v61  ;;  %1645 = vmatmul.msk.bf16.gmra.mxu3 %vm690_vm2, %v1660_v61 }
 0x15f   : > { %1622 = vmatmul.msk.bf16.gmra.mxu0 %vm690_vm2, %v1661_v56  ;;  %1630 = vmatmul.msk.bf16.gmra.mxu1 %vm690_vm2, %v1661_v56 }
 0x165   : > { %1638 = vmatmul.msk.bf16.gmra.mxu2 %vm690_vm2, %v1661_v56  ;;  %1646 = vmatmul.msk.bf16.gmra.mxu3 %vm690_vm2, %v1661_v56 }
 0x16c   : > { %v724_v14 = vpop.f32.mrf.mxu0  ;;  %v773_v19 = vpop.f32.mrf.mxu1 }
 0x16d   : > { %v1007_v20 = vmul.f32 %v930_v9, %v724_v14  ;;  %v1008_v27 = vmul.f32 %v930_v9, %v773_v19 }
 0x16f   : > { %v1167_v38 = vadd.f32 %v1090_v37, %v1007_v20  ;;  %v1168_v22 = vadd.f32 %v1090_v37, %v1008_v27 }
 0x171   : > { %v1231_v6 = vmul.f32 0.2, %v1167_v38  ;;  %v1232_v60 = vmul.f32 0.2, %v1168_v22 }
 0x173   : > { %v1295_v32 = vmax.f32 %v1167_v38, %v1231_v6  ;;  %v1296_v58 = vmax.f32 %v1168_v22, %v1232_v60 }
 0x174   : > { %v726_v29 = vpop.f32.mrf.mxu0  ;;  %v775_v35 = vpop.f32.mrf.mxu1 }
 0x175   : > { %v1011_v36 = vmul.f32 %v935_v28, %v726_v29  ;;  %v1012_v50 = vmul.f32 %v935_v28, %v775_v35 }
 0x177   : > { %v1171_v30 = vadd.f32 %v1095_v51, %v1011_v36  ;;  %v1172_v59 = vadd.f32 %v1095_v51, %v1012_v50 }
 0x178   : > { %v822_v7 = vpop.f32.mrf.mxu2  ;;  %v871_v21 = vpop.f32.mrf.mxu3 }
 0x179   : > { %v1235_v23 = vmul.f32 0.2, %v1171_v30  ;;  %v1236_v31 = vmul.f32 0.2, %v1172_v59  ;;  %v1009_v25 = vmul.f32 %v930_v9, %v822_v7  ;;  %v1010_v3 = vmul.f32 %v930_v9, %v871_v21 }
 0x17b   : > { %v1299_v40 = vmax.f32 %v1171_v30, %v1235_v23  ;;  %v1300_v24 = vmax.f32 %v1172_v59, %v1236_v31  ;;  %v1169_v42 = vadd.f32 %v1090_v37, %v1009_v25  ;;  %v1170_v55 = vadd.f32 %v1090_v37, %v1010_v3 }
 0x17c   : > { %v729_v13 = vpop.f32.mrf.mxu0  ;;  %v778_v53 = vpop.f32.mrf.mxu1 }
 0x17d   : > { %v2186_v5 = vpack.c.bf16 %v1299_v40, %v1295_v32  ;;  %v2188_v16 = vpack.c.bf16 %v1300_v24, %v1296_v58  ;;  %v1015_v61 = vmul.f32 %v2172_v4, %v729_v13  ;;  %v1016_v56 = vmul.f32 %v2172_v4, %v778_v53 }
 0x17e   : > { %v1233_v29 = vmul.f32 0.2, %v1169_v42  ;;  %v1234_v9 = vmul.f32 0.2, %v1170_v55 }
 0x17f   : > { %2438 = vst [vmem:[#allocation2_spill] sm:$0xff] %v2186_v5  ;;  %v1175_v35 = vadd.f32 %v2184_v33, %v1015_v61  ;;  %v1176_v36 = vadd.f32 %v2184_v33, %v1016_v56 }
 0x180   : > { %2439 = vst [vmem:[#allocation3_spill] sm:$0xff] %v2188_v16  ;;  %v824_v14 = vpop.f32.mrf.mxu2  ;;  %v873_v19 = vpop.f32.mrf.mxu3  ;;  %v1297_v23 = vmax.f32 %v1169_v42, %v1233_v29  ;;  %v1298_v31 = vmax.f32 %v1170_v55, %v1234_v9 }
 0x181   : > { %v1013_v20 = vmul.f32 %v935_v28, %v824_v14  ;;  %v1014_v27 = vmul.f32 %v935_v28, %v873_v19  ;;  %v1239_v40 = vmul.f32 0.2, %v1175_v35  ;;  %v1240_v24 = vmul.f32 0.2, %v1176_v36 }
 0x183   : > { %v1173_v38 = vadd.f32 %v1095_v51, %v1013_v20  ;;  %v1174_v22 = vadd.f32 %v1095_v51, %v1014_v27  ;;  %v1303_v14 = vmax.f32 %v1175_v35, %v1239_v40  ;;  %v1304_v19 = vmax.f32 %v1176_v36, %v1240_v24 }
 0x184   : > { %v731_v50 = vpop.f32.mrf.mxu0  ;;  %v780_v30 = vpop.f32.mrf.mxu1 }
 0x185   : > { %v1237_v59 = vmul.f32 0.2, %v1173_v38  ;;  %v1238_v37 = vmul.f32 0.2, %v1174_v22  ;;  %v1019_v6 = vmul.f32 %v2178_v1, %v731_v50  ;;  %v1020_v60 = vmul.f32 %v2178_v1, %v780_v30 }
 0x187   : > { %v1301_v7 = vmax.f32 %v1173_v38, %v1237_v59  ;;  %v1302_v21 = vmax.f32 %v1174_v22, %v1238_v37  ;;  %v1179_v28 = vadd.f32 %v2182_v2, %v1019_v6  ;;  %v1180_v51 = vadd.f32 %v2182_v2, %v1020_v60 }
 0x188   : > { %v827_v32 = vpop.f32.mrf.mxu2  ;;  %v876_v58 = vpop.f32.mrf.mxu3 }
 0x189   : > { %v1243_v25 = vmul.f32 0.2, %v1179_v28  ;;  %v1244_v3 = vmul.f32 0.2, %v1180_v51  ;;  %v2198_v13 = vpack.c.bf16 %v1301_v7, %v1297_v23  ;;  %v2200_v53 = vpack.c.bf16 %v1302_v21, %v1298_v31 }
 0x18a   : > { %v1017_v20 = vmul.f32 %v2172_v4, %v827_v32  ;;  %v1018_v27 = vmul.f32 %v2172_v4, %v876_v58 }
 0x18b   : > { %2440 = vst [vmem:[#allocation4_spill] sm:$0xff] %v2198_v13  ;;  %v1307_v61 = vmax.f32 %v1179_v28, %v1243_v25  ;;  %v1308_v56 = vmax.f32 %v1180_v51, %v1244_v3 }
 0x18c   : > { %2441 = vst [vmem:[#allocation5_spill] sm:$0xff] %v2200_v53  ;;  %v734_v42 = vpop.f32.mrf.mxu0  ;;  %v783_v55 = vpop.f32.mrf.mxu1  ;;  %v1177_v29 = vadd.f32 %v2184_v33, %v1017_v20  ;;  %v1178_v9 = vadd.f32 %v2184_v33, %v1018_v27 }
 0x18d   : > { %v2204_v38 = vpack.c.bf16 %v1307_v61, %v1303_v14  ;;  %v2206_v22 = vpack.c.bf16 %v1308_v56, %v1304_v19  ;;  %v1023_v50 = vmul.f32 %v2163_v63, %v734_v42  ;;  %v1024_v30 = vmul.f32 %v2163_v63, %v783_v55 }
 0x18e   : > { %v1241_v60 = vmul.f32 0.2, %v1177_v29  ;;  %v1242_v7 = vmul.f32 0.2, %v1178_v9 }
 0x18f   : > { %2442 = vst [vmem:[#allocation6_spill] sm:$0xff] %v2204_v38  ;;  %v1183_v21 = vadd.f32 %v2167_v0, %v1023_v50  ;;  %v1184_v33 = vadd.f32 %v2167_v0, %v1024_v30 }
 0x190   : > { %2443 = vst [vmem:[#allocation7_spill] sm:$0xff] %v2206_v22  ;;  %v829_v35 = vpop.f32.mrf.mxu2  ;;  %v878_v36 = vpop.f32.mrf.mxu3  ;;  %v1305_v25 = vmax.f32 %v1177_v29, %v1241_v60  ;;  %v1306_v3 = vmax.f32 %v1178_v9, %v1242_v7 }
 0x191   : > { %v1021_v59 = vmul.f32 %v2178_v1, %v829_v35  ;;  %v1022_v4 = vmul.f32 %v2178_v1, %v878_v36  ;;  %v1247_v61 = vmul.f32 0.2, %v1183_v21  ;;  %v1248_v56 = vmul.f32 0.2, %v1184_v33 }
 0x193   : > { %v1181_v37 = vadd.f32 %v2182_v2, %v1021_v59  ;;  %v1182_v6 = vadd.f32 %v2182_v2, %v1022_v4  ;;  %v1311_v35 = vmax.f32 %v1183_v21, %v1247_v61  ;;  %v1312_v36 = vmax.f32 %v1184_v33, %v1248_v56 }
 0x194   : > { %v736_v28 = vpop.f32.mrf.mxu0  ;;  %v785_v51 = vpop.f32.mrf.mxu1 }
 0x195   : > { %v1245_v23 = vmul.f32 0.2, %v1181_v37  ;;  %v1246_v31 = vmul.f32 0.2, %v1182_v6  ;;  %v1027_v40 = vmul.f32 %v2161_v62, %v736_v28  ;;  %v1028_v24 = vmul.f32 %v2161_v62, %v785_v51 }
 0x197   : > { %v1309_v32 = vmax.f32 %v1181_v37, %v1245_v23  ;;  %v1310_v1 = vmax.f32 %v1182_v6, %v1246_v31  ;;  %v1187_v58 = vadd.f32 %v2174_v8, %v1027_v40  ;;  %v1188_v2 = vadd.f32 %v2174_v8, %v1028_v24 }
 0x198   : > { %v832_v14 = vpop.f32.mrf.mxu2  ;;  %v881_v19 = vpop.f32.mrf.mxu3 }
 0x199   : > { %v1251_v20 = vmul.f32 0.2, %v1187_v58  ;;  %v1252_v27 = vmul.f32 0.2, %v1188_v2  ;;  %v2222_v42 = vpack.c.bf16 %v1309_v32, %v1305_v25  ;;  %v2224_v55 = vpack.c.bf16 %v1310_v1, %v1306_v3 }
 0x19a   : > { %v1025_v59 = vmul.f32 %v2163_v63, %v832_v14  ;;  %v1026_v4 = vmul.f32 %v2163_v63, %v881_v19 }
 0x19b   : > { %2444 = vst [vmem:[#allocation8_spill] sm:$0xff] %v2222_v42  ;;  %v1315_v50 = vmax.f32 %v1187_v58, %v1251_v20  ;;  %v1316_v30 = vmax.f32 %v1188_v2, %v1252_v27 }
 0x19c   : > { %2445 = vst [vmem:[#allocation9_spill] sm:$0xff] %v2224_v55  ;;  %v739_v29 = vpop.f32.mrf.mxu0  ;;  %v788_v9 = vpop.f32.mrf.mxu1  ;;  %v1185_v60 = vadd.f32 %v2167_v0, %v1025_v59  ;;  %v1186_v7 = vadd.f32 %v2167_v0, %v1026_v4 }
 0x19d   : > { %v2228_v37 = vpack.c.bf16 %v1315_v50, %v1311_v35  ;;  %v2230_v6 = vpack.c.bf16 %v1316_v30, %v1312_v36  ;;  %v1031_v28 = vmul.f32 %v2146_v12, %v739_v29  ;;  %v1032_v51 = vmul.f32 %v2146_v12, %v788_v9 }
 0x19e   : > { %v1249_v24 = vmul.f32 0.2, %v1185_v60  ;;  %v1250_v32 = vmul.f32 0.2, %v1186_v7 }
 0x19f   : > { %2446 = vst [vmem:[#allocation10_spill] sm:$0xff] %v2228_v37  ;;  %v1191_v1 = vadd.f32 %v2150_v34, %v1031_v28  ;;  %v1192_v0 = vadd.f32 %v2150_v34, %v1032_v51 }
 0x1a0   : > { %2447 = vst [vmem:[#allocation11_spill] sm:$0xff] %v2230_v6  ;;  %v834_v21 = vpop.f32.mrf.mxu2  ;;  %v883_v33 = vpop.f32.mrf.mxu3  ;;  %v1313_v20 = vmax.f32 %v1185_v60, %v1249_v24  ;;  %v1314_v27 = vmax.f32 %v1186_v7, %v1250_v32 }
 0x1a1   : > { %v1029_v23 = vmul.f32 %v2161_v62, %v834_v21  ;;  %v1030_v63 = vmul.f32 %v2161_v62, %v883_v33  ;;  %v1255_v50 = vmul.f32 0.2, %v1191_v1  ;;  %v1256_v30 = vmul.f32 0.2, %v1192_v0 }
 0x1a3   : > { %v1189_v31 = vadd.f32 %v2174_v8, %v1029_v23  ;;  %v1190_v40 = vadd.f32 %v2174_v8, %v1030_v63  ;;  %v1319_v21 = vmax.f32 %v1191_v1, %v1255_v50  ;;  %v1320_v33 = vmax.f32 %v1192_v0, %v1256_v30 }
 0x1a4   : > { %v741_v58 = vpop.f32.mrf.mxu0  ;;  %v790_v2 = vpop.f32.mrf.mxu1 }
 0x1a5   : > { %v1253_v25 = vmul.f32 0.2, %v1189_v31  ;;  %v1254_v3 = vmul.f32 0.2, %v1190_v40  ;;  %v1035_v61 = vmul.f32 %v2152_v45, %v741_v58  ;;  %v1036_v56 = vmul.f32 %v2152_v45, %v790_v2 }
 0x1a7   : > { %v1317_v14 = vmax.f32 %v1189_v31, %v1253_v25  ;;  %v1318_v62 = vmax.f32 %v1190_v40, %v1254_v3  ;;  %v1195_v19 = vadd.f32 %v2157_v46, %v1035_v61  ;;  %v1196_v8 = vadd.f32 %v2157_v46, %v1036_v56 }
 0x1a8   : > { %v837_v35 = vpop.f32.mrf.mxu2  ;;  %v886_v36 = vpop.f32.mrf.mxu3 }
 0x1a9   : > { %v1259_v59 = vmul.f32 0.2, %v1195_v19  ;;  %v1260_v4 = vmul.f32 0.2, %v1196_v8  ;;  %v2246_v29 = vpack.c.bf16 %v1317_v14, %v1313_v20  ;;  %v2248_v9 = vpack.c.bf16 %v1318_v62, %v1314_v27 }
 0x1aa   : > { %v1033_v23 = vmul.f32 %v2146_v12, %v837_v35  ;;  %v1034_v63 = vmul.f32 %v2146_v12, %v886_v36 }
 0x1ab   : > { %2448 = vst [vmem:[#allocation12_spill] sm:$0xff] %v2246_v29  ;;  %v1323_v28 = vmax.f32 %v1195_v19, %v1259_v59  ;;  %v1324_v51 = vmax.f32 %v1196_v8, %v1260_v4 }
 0x1ac   : > { %2449 = vst [vmem:[#allocation13_spill] sm:$0xff] %v2248_v9  ;;  %v744_v60 = vpop.f32.mrf.mxu0  ;;  %v793_v7 = vpop.f32.mrf.mxu1  ;;  %v1193_v24 = vadd.f32 %v2150_v34, %v1033_v23  ;;  %v1194_v32 = vadd.f32 %v2150_v34, %v1034_v63 }
 0x1ad   : > { %v2252_v31 = vpack.c.bf16 %v1323_v28, %v1319_v21  ;;  %v2254_v40 = vpack.c.bf16 %v1324_v51, %v1320_v33 }
 0x1ae   : > { %v1257_v3 = vmul.f32 0.2, %v1193_v24  ;;  %v1258_v61 = vmul.f32 0.2, %v1194_v32 }
 0x1af   : > { %2450 = vst [vmem:[#allocation14_spill] sm:$0xff] %v2252_v31 }
 0x1b0   : > { %2451 = vst [vmem:[#allocation15_spill] sm:$0xff] %v2254_v40  ;;  %v839_v58 = vpop.f32.mrf.mxu2  ;;  %v888_v2 = vpop.f32.mrf.mxu3  ;;  %v1321_v27 = vmax.f32 %v1193_v24, %v1257_v3  ;;  %v1322_v34 = vmax.f32 %v1194_v32, %v1258_v61 }
 0x1b1   : > { %v1037_v25 = vmul.f32 %v2152_v45, %v839_v58  ;;  %v1038_v1 = vmul.f32 %v2152_v45, %v888_v2 }
 0x1b3   : > { %v1197_v0 = vadd.f32 %v2157_v46, %v1037_v25  ;;  %v1198_v12 = vadd.f32 %v2157_v46, %v1038_v1  ;;  %v1039_v25 = vmul.f32 %v2131_v49, %v744_v60  ;;  %v1040_v1 = vmul.f32 %v2131_v49, %v793_v7 }
 0x1b4   : > { %v746_v56 = vpop.f32.mrf.mxu0  ;;  %v795_v14 = vpop.f32.mrf.mxu1 }
 0x1b5   : > { %v1261_v62 = vmul.f32 0.2, %v1197_v0  ;;  %v1262_v19 = vmul.f32 0.2, %v1198_v12 }
 0x1b7   : > { %v1325_v8 = vmax.f32 %v1197_v0, %v1261_v62  ;;  %v1326_v20 = vmax.f32 %v1198_v12, %v1262_v19  ;;  %v1043_v0 = vmul.f32 %v2135_v39, %v746_v56  ;;  %v1044_v12 = vmul.f32 %v2135_v39, %v795_v14 }
 0x1b8   : > { %v842_v50 = vpop.f32.mrf.mxu2  ;;  %v891_v30 = vpop.f32.mrf.mxu3  ;;  %v1199_v62 = vadd.f32 %v2144_v11, %v1039_v25  ;;  %v1200_v19 = vadd.f32 %v2144_v11, %v1040_v1 }
 0x1b9   : > { %v2262_v35 = vpack.c.bf16 %v1325_v8, %v1321_v27  ;;  %v2264_v36 = vpack.c.bf16 %v1326_v20, %v1322_v34  ;;  %v1203_v8 = vadd.f32 %v2142_v57, %v1043_v0  ;;  %v1204_v20 = vadd.f32 %v2142_v57, %v1044_v12 }
 0x1ba   : > { %v1263_v34 = vmul.f32 0.2, %v1199_v62  ;;  %v1264_v7 = vmul.f32 0.2, %v1200_v19 }
 0x1bb   : > { %2452 = vst [vmem:[#allocation16_spill] sm:$0xff] %v2262_v35  ;;  %v1267_v53 = vmul.f32 0.2, %v1203_v8  ;;  %v1268_v56 = vmul.f32 0.2, %v1204_v20 }
 0x1bc   : > { %2453 = vst [vmem:[#allocation17_spill] sm:$0xff] %v2264_v36  ;;  %v749_v45 = vpop.f32.mrf.mxu0  ;;  %v798_v59 = vpop.f32.mrf.mxu1  ;;  %v1327_v9 = vmax.f32 %v1199_v62, %v1263_v34  ;;  %v1328_v29 = vmax.f32 %v1200_v19, %v1264_v7 }
 0x1bd   : > { %v1047_v13 = vmul.f32 %v2123_v52, %v749_v45  ;;  %v1048_v25 = vmul.f32 %v2123_v52, %v798_v59  ;;  %v1331_v36 = vmax.f32 %v1203_v8, %v1267_v53  ;;  %v1332_v16 = vmax.f32 %v1204_v20, %v1268_v56 }
 0x1be   : > { %v2301_v59 = vmul.f32 %v2131_v49, %v842_v50 }
 0x1bf   : > { %v2321_v8 = vpack.c.bf16 %v1331_v36, %v1327_v9  ;;  %v2325_v7 = vpack.c.bf16 %v1332_v16, %v1328_v29 }
 0x1c0   : > { %v2266_v4 = vpop.f32.mrf.mxu2  ;;  %v2268_v46 = vpop.f32.mrf.mxu3 }
 0x1c1   : > { %2454 = vst [vmem:[#allocation18_spill] sm:$0xff] %v2321_v8  ;;  %v2339_v16 = vmul.f32 %v2135_v39, %v2266_v4  ;;  %v1046_v40 = vmul.f32 %v2135_v39, %v2268_v46 }
 0x1c2   : > { %2455 = vst [vmem:[#allocation19_spill] sm:$0xff] %v2325_v7 }
 0x1c4   : > { %v751_v28 = vpop.f32.mrf.mxu0  ;;  %v800_v51 = vpop.f32.mrf.mxu1 }
 0x1c5   : > { %v1051_v1 = vmul.f32 %v2121_v48, %v751_v28  ;;  %v2304_v28 = vmul.f32 %v2131_v49, %v891_v30 }
 0x1c8   : > { %v2270_v21 = vpop.f32.mrf.mxu2  ;;  %v2272_v33 = vpop.f32.mrf.mxu3 }
 0x1cc   : > { %v754_v23 = vpop.f32.mrf.mxu0  ;;  %v803_v63 = vpop.f32.mrf.mxu1 }
 0x1cd   : > { %v1056_v45 = vmul.f32 %v2103_v10, %v803_v63  ;;  %v1052_v63 = vmul.f32 %v2121_v48, %v800_v51 }
 0x1cf   : > { %v1216_v20 = vadd.f32 %v2110_v18, %v1056_v45  ;;  %v1212_v36 = vadd.f32 %v2133_v54, %v1052_v63 }
 0x1d0   : > { %v2274_v24 = vpop.f32.mrf.mxu2  ;;  %v2276_v32 = vpop.f32.mrf.mxu3 }
 0x1d1   : > { %v1276_v31 = vmul.f32 0.2, %v1212_v36  ;;  %v1053_v46 = vmul.f32 %v2121_v48, %v2274_v24 }
 0x1d3   : > { %v1340_v39 = vmax.f32 %v1212_v36, %v1276_v31  ;;  %v1054_v31 = vmul.f32 %v2121_v48, %v2276_v32 }
 0x1d4   : > { %v756_v58 = vpop.f32.mrf.mxu0  ;;  %v805_v2 = vpop.f32.mrf.mxu1 }
 0x1d5   : > { %v1059_v0 = vmul.f32 %v2112_v26, %v756_v58  ;;  %v1060_v35 = vmul.f32 %v2112_v26, %v805_v2  ;;  %v2307_v58 = vadd.f32 %v2125_v15, %v1047_v13  ;;  %v2311_v2 = vadd.f32 %v2125_v15, %v1048_v25 }
 0x1d7   : > { %v1219_v62 = vadd.f32 %v2114_v41, %v1059_v0  ;;  %v1220_v49 = vadd.f32 %v2114_v41, %v1060_v35  ;;  %v2328_v51 = vmul.f32 0.2, %v2307_v58  ;;  %v2333_v25 = vmul.f32 0.2, %v2311_v2 }
 0x1d8   : > { %v2282_v3 = vpop.f32.mrf.mxu2  ;;  %v2284_v61 = vpop.f32.mrf.mxu3 }
 0x1d9   : > { %v1284_v29 = vmul.f32 0.2, %v1220_v49  ;;  %v1335_v37 = vmax.f32 %v2307_v58, %v2328_v51  ;;  %v1336_v4 = vmax.f32 %v2311_v2, %v2333_v25 }
 0x1db   : > { %v1348_v8 = vmax.f32 %v1220_v49, %v1284_v29 }
 0x1dc   : > { %v759_v27 = vpop.f32.mrf.mxu0  ;;  %v808_v60 = vpop.f32.mrf.mxu1 }
 0x1dd   : > { %v1063_v14 = vmul.f32 %v2091_v43, %v759_v27  ;;  %v1064_v55 = vmul.f32 %v2091_v43, %v808_v60  ;;  %v1055_v27 = vmul.f32 %v2103_v10, %v754_v23  ;;  %v2314_v23 = vadd.f32 %v2133_v54, %v1051_v1 }
 0x1de   : > { %v1283_v1 = vmul.f32 0.2, %v1219_v62 }
 0x1df   : > { %v1223_v60 = vadd.f32 %v2101_v17, %v1063_v14  ;;  %v1224_v53 = vadd.f32 %v2101_v17, %v1064_v55  ;;  %v1215_v55 = vadd.f32 %v2110_v18, %v1055_v27  ;;  %v1275_v9 = vmul.f32 0.2, %v2314_v23 }
 0x1e0   : > { %v854_v42 = vpop.f32.mrf.mxu2  ;;  %v903_v12 = vpop.f32.mrf.mxu3  ;;  %v1347_v7 = vmax.f32 %v1219_v62, %v1283_v1 }
 0x1e1   : > { %v1287_v34 = vmul.f32 0.2, %v1223_v60  ;;  %v1288_v56 = vmul.f32 0.2, %v1224_v53 }
 0x1e3   : > { %v1352_v22 = vmax.f32 %v1224_v53, %v1288_v56  ;;  %v1339_v53 = vmax.f32 %v2314_v23, %v1275_v9  ;;  %v1061_v56 = vmul.f32 %v2112_v26, %v854_v42 }
 0x1e4   : > { %v761_v50 = vpop.f32.mrf.mxu0  ;;  %v810_v19 = vpop.f32.mrf.mxu1 }
 0x1e5   : > { %v1067_v30 = vmul.f32 %v2095_v44, %v761_v50  ;;  %v1068_v13 = vmul.f32 %v2095_v44, %v810_v19  ;;  %v1279_v19 = vmul.f32 0.2, %v1215_v55  ;;  %v1221_v23 = vadd.f32 %v2114_v41, %v1061_v56 }
 0x1e7   : > { %v1227_v14 = vadd.f32 %v2099_v47, %v1067_v30  ;;  %v1228_v35 = vadd.f32 %v2099_v47, %v1068_v13  ;;  %v1280_v30 = vmul.f32 0.2, %v1216_v20  ;;  %v1351_v13 = vmax.f32 %v1223_v60, %v1287_v34 }
 0x1e8   : > { %v857_v0 = vpop.f32.mrf.mxu2  ;;  %v906_v27 = vpop.f32.mrf.mxu3  ;;  %v1343_v58 = vmax.f32 %v1215_v55, %v1279_v19 }
 0x1e9   : > { %v1291_v45 = vmul.f32 0.2, %v1227_v14  ;;  %v1292_v50 = vmul.f32 0.2, %v1228_v35  ;;  %v1065_v5 = vmul.f32 %v2091_v43, %v857_v0  ;;  %v1066_v63 = vmul.f32 %v2091_v43, %v906_v27 }
 0x1ea   : > { %v1062_v43 = vmul.f32 %v2112_v26, %v903_v12  ;;  %v1344_v51 = vmax.f32 %v1216_v20, %v1280_v30  ;;  %v1384_v12 = vpack.c.bf16 %v1347_v7, %v1343_v58  ;;  %v1214_v7 = vadd.f32 %v2133_v54, %v1054_v31 }
 0x1eb   : > { %v1355_v38 = vmax.f32 %v1227_v14, %v1291_v45  ;;  %v1356_v6 = vmax.f32 %v1228_v35, %v1292_v50  ;;  %v1225_v14 = vadd.f32 %v2101_v17, %v1065_v5  ;;  %v1226_v2 = vadd.f32 %v2101_v17, %v1066_v63 }
 0x1ec   : > { %v1385_v17 = vpack.c.bf16 %v1348_v8, %v1344_v51  ;;  %v1222_v24 = vadd.f32 %v2114_v41, %v1062_v43  ;;  %v1380_v8 = vpack.c.bf16 %v1339_v53, %v1335_v37  ;;  %v1213_v41 = vadd.f32 %v2133_v54, %v1053_v46  ;;  %v2459_v51 = vld [vmem:[#allocation15_spill] sm:$0xff] }
 0x1ed   : > { %v1388_v60 = vpack.c.bf16 %v1355_v38, %v1351_v13  ;;  %v1389_v34 = vpack.c.bf16 %v1356_v6, %v1352_v22  ;;  %v1057_v38 = vmul.f32 %v2103_v10, %v2282_v3  ;;  %v1058_v22 = vmul.f32 %v2103_v10, %v2284_v61 }
 0x1ee   : > { %v1289_v62 = vmul.f32 0.2, %v1225_v14  ;;  %v1049_v3 = vmul.f32 %v2123_v52, %v2270_v21  ;;  %v1290_v10 = vmul.f32 0.2, %v1226_v2  ;;  %v1381_v21 = vpack.c.bf16 %v1340_v39, %v1336_v4  ;;  %v2457_v4 = vld [vmem:[#allocation19_spill] sm:$0xff] }
 0x1ef   : > { %1392 = vmatpush.bf16.msra.mxu0 %v1388_v60  ;;  %1405 = vmatpush.bf16.msra.mxu1 %v1389_v34  ;;  %v1217_v48 = vadd.f32 %v2110_v18, %v1057_v38  ;;  %v1218_v32 = vadd.f32 %v2110_v18, %v1058_v22  ;;  %v1285_v35 = vmul.f32 0.2, %v1221_v23  ;;  %v1286_v25 = vmul.f32 0.2, %v1222_v24 }
 0x1f0   : > { %v859_v42 = vpop.f32.mrf.mxu2  ;;  %v908_v26 = vpop.f32.mrf.mxu3  ;;  %v1354_v9 = vmax.f32 %v1226_v2, %v1290_v10  ;;  %v1205_v0 = vadd.f32 %v2142_v57, %v2339_v16  ;;  %v1206_v27 = vadd.f32 %v2142_v57, %v1046_v40  ;;  %v1277_v45 = vmul.f32 0.2, %v1213_v41  ;;  %v1359_v10 = vld [vmem:[%s2426_s6] sm:$0x1] }
 0x1f1   : > { %v1069_v5 = vmul.f32 %v2095_v44, %v859_v42  ;;  %v1070_v6 = vmul.f32 %v2095_v44, %v908_v26  ;;  %v1050_v44 = vmul.f32 %v2123_v52, %v2272_v33  ;;  %v1209_v52 = vadd.f32 %v2125_v15, %v1049_v3  ;;  %v2460_v26 = vld [vmem:[#allocation10_spill] sm:$0xff]  ;;  %v2465_v3 = vld [vmem:[#allocation3_spill] sm:$0xff] }
 0x1f2   : > { %v1281_v37 = vmul.f32 0.2, %v1217_v48  ;;  %v1282_v33 = vmul.f32 0.2, %v1218_v32  ;;  %v1278_v50 = vmul.f32 0.2, %v1214_v7  ;;  %v1349_v19 = vmax.f32 %v1221_v23, %v1285_v35 }
 0x1f3   : > { %v1229_v61 = vadd.f32 %v2099_v47, %v1069_v5  ;;  %v1230_v49 = vadd.f32 %v2099_v47, %v1070_v6  ;;  %1393 = vmatpush.bf16.msra.mxu0 %v1384_v12  ;;  %1406 = vmatpush.bf16.msra.mxu1 %v1385_v17  ;;  %v1353_v47 = vmax.f32 %v1225_v14, %v1289_v62  ;;  %v1273_v60 = vmul.f32 0.2, %v1209_v52  ;;  %v2461_v5 = vld [vmem:[#allocation11_spill] sm:$0xff]  ;;  %v2462_v23 = vld [vmem:[#allocation6_spill] sm:$0xff] }
 0x1f4   : > { %v1210_v18 = vadd.f32 %v2125_v15, %v1050_v44  ;;  %v1350_v30 = vmax.f32 %v1222_v24, %v1286_v25  ;;  %v1201_v13 = vadd.f32 %v2144_v11, %v2301_v59  ;;  %v1202_v63 = vadd.f32 %v2144_v11, %v2304_v28  ;;  %v2456_v15 = vld [vmem:[#allocation18_spill] sm:$0xff]  ;;  %v2463_v24 = vld [vmem:[#allocation7_spill] sm:$0xff]  ;;  %v2468_v44 = vld [vmem:[#allocation12_spill] sm:$0xff] }
 0x1f5   : > { %v1293_v55 = vmul.f32 0.2, %v1229_v61  ;;  %v1294_v20 = vmul.f32 0.2, %v1230_v49  ;;  %v1345_v34 = vmax.f32 %v1217_v48, %v1281_v37  ;;  %v1346_v57 = vmax.f32 %v1218_v32, %v1282_v33  ;;  %v2458_v59 = vld [vmem:[#allocation14_spill] sm:$0xff]  ;;  %v2469_v48 = vld [vmem:[#allocation13_spill] sm:$0xff] }
 0x1f6   : > { %v1274_v16 = vmul.f32 0.2, %v1210_v18  ;;  %v1269_v40 = vmul.f32 0.2, %v1205_v0  ;;  %v1270_v53 = vmul.f32 0.2, %v1206_v27  ;;  %v1341_v56 = vmax.f32 %v1213_v41, %v1277_v45 }
 0x1f7   : > { %v1357_v36 = vmax.f32 %v1229_v61, %v1293_v55  ;;  %v1358_v1 = vmax.f32 %v1230_v49, %v1294_v20  ;;  %1394 = vmatpush.bf16.msra.mxu0 %v1380_v8  ;;  %1407 = vmatpush.bf16.msra.mxu1 %v1381_v21  ;;  %v1342_v43 = vmax.f32 %v1214_v7, %v1278_v50  ;;  %v1265_v11 = vmul.f32 0.2, %v1201_v13  ;;  %v2464_v62 = vld [vmem:[#allocation2_spill] sm:$0xff]  ;;  %v2466_v61 = vld [vmem:[#allocation16_spill] sm:$0xff]  ;;  %v2467_v49 = vld [vmem:[#allocation17_spill] sm:$0xff] }
 0x1f8   : > { %v1386_v14 = vpack.c.bf16 %v1349_v19, %v1345_v34  ;;  %v1387_v58 = vpack.c.bf16 %v1350_v30, %v1346_v57  ;;  %v1266_v28 = vmul.f32 0.2, %v1202_v63  ;;  %v1337_v2 = vmax.f32 %v1209_v52, %v1273_v60  ;;  %v2470_v32 = vld [vmem:[#allocation8_spill] sm:$0xff]  ;;  %v2471_v8 = vld [vmem:[#allocation9_spill] sm:$0xff] }
 0x1f9   : > { %v1390_v54 = vpack.c.bf16 %v1357_v36, %v1353_v47  ;;  %v1391_v29 = vpack.c.bf16 %v1358_v1, %v1354_v9  ;;  %v1338_v39 = vmax.f32 %v1210_v18, %v1274_v16  ;;  %v1333_v46 = vmax.f32 %v1205_v0, %v1269_v40  ;;  %v2472_v41 = vld [vmem:[#allocation4_spill] sm:$0xff]  ;;  %v2473_v55 = vld [vmem:[#allocation5_spill] sm:$0xff] }
 0x1fa   : > { %v1334_v38 = vmax.f32 %v1206_v27, %v1270_v53  ;;  %v1382_v22 = vpack.c.bf16 %v1341_v56, %v1337_v2  ;;  %v1329_v6 = vmax.f32 %v1201_v13, %v1265_v11  ;;  %v1330_v12 = vmax.f32 %v1202_v63, %v1266_v28 }
 0x1fb   : > { %1395 = vmatpush.bf16.msra.mxu0 %v2456_v15  ;;  %1408 = vmatpush.bf16.msra.mxu1 %v2457_v4  ;;  %v1383_v42 = vpack.c.bf16 %v1342_v43, %v1338_v39  ;;  %v1457_v25 = vlaneseq }
 0x1fc   : > { %1418 = vmatpush.bf16.msra.mxu2 %v1390_v54  ;;  %1431 = vmatpush.bf16.msra.mxu3 %v1391_v29  ;;  %v1378_v17 = vpack.c.bf16 %v1333_v46, %v1329_v6  ;;  %v1379_v31 = vpack.c.bf16 %v1334_v38, %v1330_v12 }
 0x1fd   : > { %vm1459_vm5 = vcmp.lt.s32.totalorder %v1457_v25, 512 }
 0x1ff   : > { %1396 = vmatpush.bf16.msra.mxu0 %v2458_v59  ;;  %1409 = vmatpush.bf16.msra.mxu1 %v2459_v51 }
 0x200   : > { %1419 = vmatpush.bf16.msra.mxu2 %v1386_v14  ;;  %1432 = vmatpush.bf16.msra.mxu3 %v1387_v58 }
 0x203   : > { %1397 = vmatpush.bf16.msra.mxu0 %v2460_v26  ;;  %1410 = vmatpush.bf16.msra.mxu1 %v2461_v5 }
 0x204   : > { %1420 = vmatpush.bf16.msra.mxu2 %v1382_v22  ;;  %1433 = vmatpush.bf16.msra.mxu3 %v1383_v42 }
 0x207   : > { %1398 = vmatpush.bf16.msra.mxu0 %v2462_v23  ;;  %1411 = vmatpush.bf16.msra.mxu1 %v2463_v24 }
 0x208   : > { %1421 = vmatpush.bf16.msra.mxu2 %v1378_v17  ;;  %1434 = vmatpush.bf16.msra.mxu3 %v1379_v31 }
 0x20b   : > { %1399 = vmatpush.bf16.msra.mxu0 %v2464_v62  ;;  %1412 = vmatpush.bf16.msra.mxu1 %v2465_v3 }
 0x20c   : > { %1422 = vmatpush.bf16.msra.mxu2 %v2466_v61  ;;  %1435 = vmatpush.bf16.msra.mxu3 %v2467_v49 }
 0x20e   : > { %1400 = vmatmul.bf16.vlgmr.msra.gmra.mxu0 %v1359_v10  ;;  %1413 = vmatmul.bf16.vlgmr.msra.gmra.mxu1 %v1359_v10 }
 0x210   : > { %1423 = vmatpush.bf16.msra.mxu2 %v2468_v44  ;;  %1436 = vmatpush.bf16.msra.mxu3 %v2469_v48 }
 0x214   : > { %1424 = vmatpush.bf16.msra.mxu2 %v2470_v32  ;;  %1437 = vmatpush.bf16.msra.mxu3 %v2471_v8 }
 0x218   : > { %1425 = vmatpush.bf16.msra.mxu2 %v2472_v41  ;;  %1438 = vmatpush.bf16.msra.mxu3 %v2473_v55 }
 0x21b   : > { %1426 = vmatmul.bf16.vlgmr.msra.gmra.mxu2 %v1359_v10  ;;  %1439 = vmatmul.bf16.vlgmr.msra.gmra.mxu3 %v1359_v10 }
 0x28b   : > { %v1401_v20 = vpop.f32.mrf.mxu0  ;;  %v1414_v21 = vpop.f32.mrf.mxu1 }
 0x28c   : > { %v1448_v47 = vrot.slane %v1414_v21, 7 }
 0x28e   : > { %v1452_v18 = vsel %vm1451_vm3, %v1401_v20, %v1448_v47 }
 0x293   : > { %v1403_v7 = vpop.f32.mrf.mxu0  ;;  %v1416_v35 = vpop.f32.mrf.mxu1 }
 0x29e   : > { %v1427_v9 = vpop.f32.mrf.mxu2  ;;  %v1440_v36 = vpop.f32.mrf.mxu3 }
 0x29f   : > { %v1449_v1 = vrot.slane %v1427_v9, 6  ;;  %v1450_v52 = vrot.slane %v1440_v36, 5 }
 0x2a1   : > { %v1454_v37 = vsel %vm1453_vm4, %v1449_v1, %v1450_v52 }
 0x2a2   : > { %v1455_v33 = vsel %vm425_vm0, %v1452_v18, %v1454_v37 }
 0x2a3   : > { %1461 = vst.msk [vmem:[%s314_s23] sm:$0xf] %vm1459_vm5, %v1455_v33 }
 0x2a6   : > { %v1429_v0 = vpop.f32.mrf.mxu2  ;;  %v1442_v27 = vpop.f32.mrf.mxu3 }
 0x2a7 PF: > { %s17_s26 = sadd.s32 1, %s1712_s26   ;;  %s2474_s24 = smov %s1708_s25 }
 0x2a8   : > { %p14_p5 = scmp.ge.s32.totalorder %s17_s26, 4   ;;  %s2475_s25 = smov %s2477_s27 }
 0x2aa   :  { %16 = sbr.rel (!%p14_p5) target bundleno = 2 (0x2), region = 79 }

</bundles_post_ra>
